<compile_context>
chip_gen: v7x
topology: tpu7x:2x2x1
jax: 0.10.0
libtpu: 0.0.40
codegen_flags: <defaults>
</compile_context>

<pallas_src>
import jax
import jax.numpy as jnp
from jax import lax
from jax.experimental import pallas as pl
from jax.experimental.pallas import tpu as pltpu

K_IN = 14               # logical input features (6 data + 8 label per the CGAN spec)
H1, H2, H3 = 512, 256, 128


def discriminator_kernel(x_ref,
                         w1_ref, b1_ref,
                         w2_ref, b2_ref,
                         w3_ref, b3_ref,
                         w4_ref, b4_ref,
                         o_ref):
    # x tile is f32 [TB, 14]; cast to bf16 in-kernel (no extra HBM pass in the wrapper).
    x = x_ref[...].astype(jnp.bfloat16)

    h1 = jnp.dot(x, w1_ref[...], preferred_element_type=jnp.float32) + b1_ref[...]
    h1 = jnp.maximum(h1, 0.2 * h1)                       # LeakyReLU(0.2)

    h2 = jnp.dot(h1.astype(jnp.bfloat16), w2_ref[...],
                 preferred_element_type=jnp.float32) + b2_ref[...]
    h2 = jnp.maximum(h2, 0.2 * h2)

    h3 = jnp.dot(h2.astype(jnp.bfloat16), w3_ref[...],
                 preferred_element_type=jnp.float32) + b3_ref[...]
    h3 = jnp.maximum(h3, 0.2 * h3)

    # fc4: out_features == 1. Contract the feature dim of h3 against the single w4
    # row with a transposed-RHS dot so the logits land directly in lane orientation
    # (1, TB) -> lane-dense, (mostly) unmasked stores.
    logit = lax.dot_general(w4_ref[...], h3, (((1,), (1,)), ((), ())),
                            preferred_element_type=jnp.float32) + b4_ref[...]

    # Sigmoid: exp + approximate reciprocal, both on the (otherwise idle) EUP slot.
    o_ref[...] = pl.reciprocal(1.0 + jnp.exp(-logit), approx=True)


def _pick_tb(batch, tb):
    """256-multiple batch tile; keep >=2 grid blocks when the batch allows it."""
    if tb is None:
        tb = 512
    # v7x has 2 TensorCores sharing the "parallel" grid axis: don't collapse to 1 block
    # unless the batch itself is tiny. 256 is the floor (v6e/v7x MXU is 2x256x256).
    while tb > 256 and pl.cdiv(batch, tb) < 2:
        tb //= 2
    return tb


def discriminator_forward(x, params, *, tb=None):
    """x: [B, 14] float32 -> [B, 1] float32."""
    B, k = x.shape
    assert k == K_IN
    w1, b1, w2, b2, w3, b3, w4_row, b4 = params

    tb = _pick_tb(B, tb)
    n_blocks = pl.cdiv(B, tb)
    b_pad = n_blocks * tb
    x_p = x if b_pad == B else jnp.pad(x, ((0, b_pad - B), (0, 0)))

    # Weights/biases: full-array blocks with constant index_maps -> VMEM-resident.
    resident = lambda a: pl.BlockSpec(a.shape, lambda i: (0,) * a.ndim)

    param_bytes = sum(int(a.size) * a.dtype.itemsize
                      for a in (w1, b1, w2, b2, w3, b3, w4_row, b4))
    cost = pl.CostEstimate(
        flops=2 * b_pad * (K_IN * H1 + H1 * H2 + H2 * H3 + H3 * 1),
        transcendentals=2 * b_pad,                      # exp + reciprocal per row
        bytes_accessed=b_pad * K_IN * 4 + b_pad * 4 + param_bytes,
    )

    out = pl.pallas_call(
        discriminator_kernel,
        out_shape=jax.ShapeDtypeStruct((1, b_pad), jnp.float32),
        grid_spec=pl.GridSpec(
            grid=(n_blocks,),
            in_specs=[
                pl.BlockSpec((tb, K_IN), lambda i: (i, 0)),   # x tile, pipelined
                resident(w1), resident(b1),
                resident(w2), resident(b2),
                resident(w3), resident(b3),
                resident(w4_row), resident(b4),
            ],
            out_specs=pl.BlockSpec((1, tb), lambda i: (0, i)),  # lane-dense logit row
        ),
        compiler_params=pltpu.CompilerParams(
            dimension_semantics=("parallel",),
        ),
        cost_estimate=cost,
    )(x_p, w1, b1, w2, b2, w3, b3, w4_row, b4)

    return out.reshape(b_pad, 1)[:B]


def init_linear(key, fan_in, fan_out):
    # Mimic torch.nn.Linear default init: U(-1/sqrt(fan_in), 1/sqrt(fan_in)).
    kw, kb = jax.random.split(key)
    bound = 1.0 / jnp.sqrt(jnp.float32(fan_in))
    w = jax.random.uniform(kw, (fan_in, fan_out), jnp.float32, -bound, bound)
    b = jax.random.uniform(kb, (1, fan_out), jnp.float32, -bound, bound)
    return w, b


def pack_params(w1, b1, w2, b2, w3, b3, w4, b4):
    """Convert f32 torch-layout-equivalent params into the kernel layout."""
    w1p = w1.astype(jnp.bfloat16)                 # [14, 512]
    w2p = w2.astype(jnp.bfloat16)                 # [512, 256]
    w3p = w3.astype(jnp.bfloat16)                 # [256, 128]
    w4_row = w4.reshape(1, H3).astype(jnp.float32)  # [1, 128] (fc4 kept in f32)
    return (w1p, b1, w2p, b2, w3p, b3, w4_row, b4)


if __name__ == "__main__":
    key = jax.random.PRNGKey(0)
    k_x, k1, k2, k3, k4 = jax.random.split(key, 5)

    B = 300  # exercises multi-block batch tiling (2 grid steps at tb=256) + tail padding
    x = jax.random.normal(k_x, (B, K_IN), jnp.float32)

    w1, b1 = init_linear(k1, K_IN, H1)
    w2, b2 = init_linear(k2, H1, H2)
    w3, b3 = init_linear(k3, H2, H3)
    w4, b4 = init_linear(k4, H3, 1)
    params = pack_params(w1, b1, w2, b2, w3, b3, w4, b4)

    # Single jit so the batch-tail pad / final slice live in the same XLA program
    # as the pallas_call.
    fwd = jax.jit(discriminator_forward)
    out = jax.block_until_ready(fwd(x, params))

    # Pure-JAX reference using the same bf16-rounded weights / bf16-rounded activations.
    def ref(xin):
        def lin(a, w, b):
            return (a.astype(jnp.bfloat16).astype(jnp.float32)
                    @ w.astype(jnp.bfloat16).astype(jnp.float32) + b)
        h = lin(xin, w1, b1)
        h = jnp.where(h > 0, h, 0.2 * h)
        h = lin(h, w2, b2)
        h = jnp.where(h > 0, h, 0.2 * h)
        h = lin(h, w3, b3)
        h = jnp.where(h > 0, h, 0.2 * h)
        return jax.nn.sigmoid(h @ w4 + b4)

    expected = ref(x)
    assert out.shape == (B, 1)
    assert jnp.all(jnp.isfinite(out))
    assert jnp.all((out >= 0.0) & (out <= 1.0))
    assert jnp.allclose(out, expected, atol=2e-2, rtol=2e-2)
    print("KERNEL_OK")
</pallas_src>

<mosaic_0001>
module attributes {stable_mosaic.version = 11 : i64} {
  func.func @discriminator_kernel(%arg0: i32, %arg1: memref<256x14xf32, #tpu.memory_space<vmem>>, %arg2: memref<14x512xbf16, #tpu.memory_space<vmem>>, %arg3: memref<1x512xf32, #tpu.memory_space<vmem>>, %arg4: memref<512x256xbf16, #tpu.memory_space<vmem>>, %arg5: memref<1x256xf32, #tpu.memory_space<vmem>>, %arg6: memref<256x128xbf16, #tpu.memory_space<vmem>>, %arg7: memref<1x128xf32, #tpu.memory_space<vmem>>, %arg8: memref<1x128xf32, #tpu.memory_space<vmem>>, %arg9: memref<1x1xf32, #tpu.memory_space<vmem>>, %arg10: memref<1x256xf32, #tpu.memory_space<vmem>>) attributes {dimension_semantics = [#tpu.dimension_semantics<parallel>], iteration_bounds = array<i64: 2>, scalar_prefetch = 0 : i64, scratch_operands = 0 : i64, tpu.core_type = #tpu.core_type<tc>, window_params = [{transform_indices = @transform_0, window_bounds = array<i64: 256, 14>}, {pipeline_mode = #tpu.pipeline_mode<synchronous>, transform_indices = @transform_1, window_bounds = array<i64: 14, 512>}, {pipeline_mode = #tpu.pipeline_mode<synchronous>, transform_indices = @transform_2, window_bounds = array<i64: 1, 512>}, {pipeline_mode = #tpu.pipeline_mode<synchronous>, transform_indices = @transform_3, window_bounds = array<i64: 512, 256>}, {pipeline_mode = #tpu.pipeline_mode<synchronous>, transform_indices = @transform_4, window_bounds = array<i64: 1, 256>}, {pipeline_mode = #tpu.pipeline_mode<synchronous>, transform_indices = @transform_5, window_bounds = array<i64: 256, 128>}, {pipeline_mode = #tpu.pipeline_mode<synchronous>, transform_indices = @transform_6, window_bounds = array<i64: 1, 128>}, {pipeline_mode = #tpu.pipeline_mode<synchronous>, transform_indices = @transform_7, window_bounds = array<i64: 1, 128>}, {pipeline_mode = #tpu.pipeline_mode<synchronous>, transform_indices = @transform_8, window_bounds = array<i64: 1, 1>}, {transform_indices = @transform_9, window_bounds = array<i64: 1, 256>}]} {
    %c0 = arith.constant 0 : index
    %c0_0 = arith.constant 0 : index
    %0 = vector.load %arg1[%c0, %c0_0] : memref<256x14xf32, #tpu.memory_space<vmem>>, vector<256x14xf32>
    %1 = arith.truncf %0 : vector<256x14xf32> to vector<256x14xbf16>
    %c0_1 = arith.constant 0 : index
    %c0_2 = arith.constant 0 : index
    %2 = vector.load %arg2[%c0_1, %c0_2] : memref<14x512xbf16, #tpu.memory_space<vmem>>, vector<14x512xbf16>
    %cst = arith.constant dense<0.000000e+00> : vector<256x512xf32>
    %3 = tpu.matmul %1, %2, %cst {dimension_numbers = #tpu.dot_dimension_numbers<[1], [0], [0], [1], [0, 0, 1, 1], [], []>} : vector<256x14xbf16>, vector<14x512xbf16>, vector<256x512xf32> -> vector<256x512xf32>
    %c0_3 = arith.constant 0 : index
    %c0_4 = arith.constant 0 : index
    %4 = vector.load %arg3[%c0_3, %c0_4] : memref<1x512xf32, #tpu.memory_space<vmem>>, vector<1x512xf32>
    %5 = vector.broadcast %4 : vector<1x512xf32> to vector<256x512xf32>
    %6 = arith.addf %3, %5 : vector<256x512xf32>
    %cst_5 = arith.constant 2.000000e-01 : f32
    %7 = vector.broadcast %cst_5 : f32 to vector<256x512xf32>
    %8 = arith.mulf %7, %6 : vector<256x512xf32>
    %9 = arith.maximumf %6, %8 : vector<256x512xf32>
    %10 = arith.truncf %9 : vector<256x512xf32> to vector<256x512xbf16>
    %c0_6 = arith.constant 0 : index
    %c0_7 = arith.constant 0 : index
    %11 = vector.load %arg4[%c0_6, %c0_7] : memref<512x256xbf16, #tpu.memory_space<vmem>>, vector<512x256xbf16>
    %cst_8 = arith.constant dense<0.000000e+00> : vector<256x256xf32>
    %12 = tpu.matmul %10, %11, %cst_8 {dimension_numbers = #tpu.dot_dimension_numbers<[1], [0], [0], [1], [0, 0, 1, 1], [], []>} : vector<256x512xbf16>, vector<512x256xbf16>, vector<256x256xf32> -> vector<256x256xf32>
    %c0_9 = arith.constant 0 : index
    %c0_10 = arith.constant 0 : index
    %13 = vector.load %arg5[%c0_9, %c0_10] : memref<1x256xf32, #tpu.memory_space<vmem>>, vector<1x256xf32>
    %14 = vector.broadcast %13 : vector<1x256xf32> to vector<256x256xf32>
    %15 = arith.addf %12, %14 : vector<256x256xf32>
    %cst_11 = arith.constant 2.000000e-01 : f32
    %16 = vector.broadcast %cst_11 : f32 to vector<256x256xf32>
    %17 = arith.mulf %16, %15 : vector<256x256xf32>
    %18 = arith.maximumf %15, %17 : vector<256x256xf32>
    %19 = arith.truncf %18 : vector<256x256xf32> to vector<256x256xbf16>
    %c0_12 = arith.constant 0 : index
    %c0_13 = arith.constant 0 : index
    %20 = vector.load %arg6[%c0_12, %c0_13] : memref<256x128xbf16, #tpu.memory_space<vmem>>, vector<256x128xbf16>
    %cst_14 = arith.constant dense<0.000000e+00> : vector<256x128xf32>
    %21 = tpu.matmul %19, %20, %cst_14 {dimension_numbers = #tpu.dot_dimension_numbers<[1], [0], [0], [1], [0, 0, 1, 1], [], []>} : vector<256x256xbf16>, vector<256x128xbf16>, vector<256x128xf32> -> vector<256x128xf32>
    %c0_15 = arith.constant 0 : index
    %c0_16 = arith.constant 0 : index
    %22 = vector.load %arg7[%c0_15, %c0_16] : memref<1x128xf32, #tpu.memory_space<vmem>>, vector<1x128xf32>
    %23 = vector.broadcast %22 : vector<1x128xf32> to vector<256x128xf32>
    %24 = arith.addf %21, %23 : vector<256x128xf32>
    %cst_17 = arith.constant 2.000000e-01 : f32
    %25 = vector.broadcast %cst_17 : f32 to vector<256x128xf32>
    %26 = arith.mulf %25, %24 : vector<256x128xf32>
    %27 = arith.maximumf %24, %26 : vector<256x128xf32>
    %c0_18 = arith.constant 0 : index
    %c0_19 = arith.constant 0 : index
    %28 = vector.load %arg8[%c0_18, %c0_19] : memref<1x128xf32, #tpu.memory_space<vmem>>, vector<1x128xf32>
    %cst_20 = arith.constant dense<0.000000e+00> : vector<1x256xf32>
    %29 = tpu.matmul %28, %27, %cst_20 {dimension_numbers = #tpu.dot_dimension_numbers<[1], [1], [0], [0], [0, 0, 1, 0], [], []>} : vector<1x128xf32>, vector<256x128xf32>, vector<1x256xf32> -> vector<1x256xf32>
    %c0_21 = arith.constant 0 : index
    %c0_22 = arith.constant 0 : index
    %30 = vector.load %arg9[%c0_21, %c0_22] : memref<1x1xf32, #tpu.memory_space<vmem>>, vector<1x1xf32>
    %31 = vector.broadcast %30 : vector<1x1xf32> to vector<1x256xf32>
    %32 = arith.addf %29, %31 : vector<1x256xf32>
    %cst_23 = arith.constant 0.000000e+00 : f32
    %33 = vector.broadcast %cst_23 : f32 to vector<1x256xf32>
    %34 = arith.subf %33, %32 : vector<1x256xf32>
    %35 = math.exp %34 : vector<1x256xf32>
    %cst_24 = arith.constant 1.000000e+00 : f32
    %36 = vector.broadcast %cst_24 : f32 to vector<1x256xf32>
    %37 = arith.addf %36, %35 : vector<1x256xf32>
    %38 = tpu.reciprocal %37 {approx = true} : vector<1x256xf32> -> vector<1x256xf32>
    %c0_25 = arith.constant 0 : index
    %c0_26 = arith.constant 0 : index
    %39 = vector.load %arg10[%c0_25, %c0_26] : memref<1x256xf32, #tpu.memory_space<vmem>>, vector<1x256xf32>
    tpu.vector_store %arg10[%c0_25, %c0_26], %38 {strides = array<i32>} : memref<1x256xf32, #tpu.memory_space<vmem>>, vector<1x256xf32>,
    return
  }
  func.func @transform_0(%arg0: i32) -> (i32, i32) {
    %c0_i32 = arith.constant 0 : i32
    %c0_i32_0 = arith.constant 0 : i32
    return %arg0, %c0_i32 : i32, i32
  }
  func.func @transform_1(%arg0: i32) -> (i32, i32) {
    %c0_i32 = arith.constant 0 : i32
    %c0_i32_0 = arith.constant 0 : i32
    %c0_i32_1 = arith.constant 0 : i32
    return %c0_i32, %c0_i32_0 : i32, i32
  }
  func.func @transform_2(%arg0: i32) -> (i32, i32) {
    %c0_i32 = arith.constant 0 : i32
    %c0_i32_0 = arith.constant 0 : i32
    %c0_i32_1 = arith.constant 0 : i32
    return %c0_i32, %c0_i32_0 : i32, i32
  }
  func.func @transform_3(%arg0: i32) -> (i32, i32) {
    %c0_i32 = arith.constant 0 : i32
    %c0_i32_0 = arith.constant 0 : i32
    %c0_i32_1 = arith.constant 0 : i32
    return %c0_i32, %c0_i32_0 : i32, i32
  }
  func.func @transform_4(%arg0: i32) -> (i32, i32) {
    %c0_i32 = arith.constant 0 : i32
    %c0_i32_0 = arith.constant 0 : i32
    %c0_i32_1 = arith.constant 0 : i32
    return %c0_i32, %c0_i32_0 : i32, i32
  }
  func.func @transform_5(%arg0: i32) -> (i32, i32) {
    %c0_i32 = arith.constant 0 : i32
    %c0_i32_0 = arith.constant 0 : i32
    %c0_i32_1 = arith.constant 0 : i32
    return %c0_i32, %c0_i32_0 : i32, i32
  }
  func.func @transform_6(%arg0: i32) -> (i32, i32) {
    %c0_i32 = arith.constant 0 : i32
    %c0_i32_0 = arith.constant 0 : i32
    %c0_i32_1 = arith.constant 0 : i32
    return %c0_i32, %c0_i32_0 : i32, i32
  }
  func.func @transform_7(%arg0: i32) -> (i32, i32) {
    %c0_i32 = arith.constant 0 : i32
    %c0_i32_0 = arith.constant 0 : i32
    %c0_i32_1 = arith.constant 0 : i32
    return %c0_i32, %c0_i32_0 : i32, i32
  }
  func.func @transform_8(%arg0: i32) -> (i32, i32) {
    %c0_i32 = arith.constant 0 : i32
    %c0_i32_0 = arith.constant 0 : i32
    %c0_i32_1 = arith.constant 0 : i32
    return %c0_i32, %c0_i32_0 : i32, i32
  }
  func.func @transform_9(%arg0: i32) -> (i32, i32) {
    %c0_i32 = arith.constant 0 : i32
    %c0_i32_0 = arith.constant 0 : i32
    return %c0_i32, %arg0 : i32, i32
  }
}

</mosaic_0001>

<bundles_post_ra>
// kernel: discriminator_forward.1
= control target key start
LH: loop header
LB: loop body
LE: loop exit
PB: predicated region body
PF: predicated region fallthrough
CT: control target
= control target key end

     0   :  { %s3299_s11 = smov 0   ;;  %s4148_s0 = inlined_call_operand.vmem [shape: f32[512,14], index: 0, kind: input, shape index: {}]   ;;  %s4149_s1 = inlined_call_operand.vmem [shape: bf16[14,512], index: 1, kind: input, shape index: {}]   ;;  %s4150_s2 = inlined_call_operand.vmem [shape: f32[1,512], index: 2, kind: input, shape index: {}]   ;;  %s4151_s3 = inlined_call_operand.vmem [shape: bf16[512,256], index: 3, kind: input, shape index: {}]   ;;  %s4152_s4 = inlined_call_operand.vmem [shape: f32[1,256], index: 4, kind: input, shape index: {}]   ;;  %s4153_s5 = inlined_call_operand.vmem [shape: bf16[256,128], index: 5, kind: input, shape index: {}]   ;;  %s4154_s6 = inlined_call_operand.vmem [shape: f32[1,128], index: 6, kind: input, shape index: {}]   ;;  %s4155_s7 = inlined_call_operand.vmem [shape: f32[1,128], index: 7, kind: input, shape index: {}]   ;;  %s4156_s8 = inlined_call_operand.<no memory space> [shape: f32[1,1], index: 8, kind: input, shape index: {}]   ;;  %s4157_s9 = inlined_call_operand.vmem [shape: f32[1,512], index: 9, kind: output, shape index: {}]  }
   0x1   :  { %v14_v0 = vstv %s4156_s8 }
   0x2   :  { %15 = vst [vmem:[#allocation2] sm:$0x1] %v14_v0 }
   0x3 LB: > { %s2662_s12 = sadd.s32 4294967295, %s3242_s11   ;;  %p2666_p0 = scmp.ge.s32.totalorder %s3242_s11, 1  ;;  %s3242_s11 = sphi %s3299_s11, %s21_s11  }
   0x4   : > { %p290_p1 = scmp.lt.s32.totalorder %s3242_s11, 3 }
   0x6   : > { %p291_p2 = pnand %p2666_p0, %p290_p1 }
   0x7   : > { %v3110_v1 = vld [vmem:[%s4149_s1 + $0x4] ss:$16 sps:$4 sm:$0x7f] (!%p291_p2)   ;;  %vm476_vm0 = vcmask (!%p291_p2), 1046528   ;;  %s2667_s16 = sshll.u32 (!%p291_p2), %s2662_s12, 5  ;;  %v3244_v3 = vmov (!%p291_p2), 0  }
   0x8   : > { %294 = sbr.rel (%p291_p2) target bundleno = 1200 (0x4b0), region = 56  ;;  %v3112_v2 = vld [vmem:[%s4149_s1] ss:$16 sps:$4 sm:$0x7f] (!%p291_p2)   ;;  %2674 = vmatprep.subr.msk.bf16.mxu0 (!%p291_p2), %vm476_vm0, %v3110_v1  ;;  %521 = vmatprep.mubr.bf16.mxu0 (!%p291_p2), %v3244_v3  ;;  %p326_p3 = scmp.lt.s32.totalorder (!%p291_p2), %s2667_s16, 63  ;;  %vm427_vm1 = vcmask (!%p291_p2), 113664  }
   0x9   : > { %v478_v4 = vsel (!%p291_p2), %vm476_vm0, %v3112_v2, 0  ;;  %2969 = vmatprep.subr.msk.bf16.mxu1 (!%p291_p2), %vm476_vm0, %v3110_v1  ;;  %601 = vmatprep.mubr.bf16.mxu1 (!%p291_p2), %v3244_v3  ;;  %v3113_v5 = vld [vmem:[%s4149_s1 + $0xc] ss:$16 sps:$4 sm:$0x7f] (!%p291_p2)   ;;  %v3116_v9 = vld [vmem:[%s4151_s3] ss:$8 sps:$4 sm:$0xff] (!%p291_p2)  }
   0xa   : > { %490 = vmatpush1.bf16.msra.mxu0 (!%p291_p2), %v478_v4  ;;  %2970 = vmatpush1.bf16.msra.mxu1 (!%p291_p2), %v478_v4  ;;  %v3118_v6 = vld [vmem:[%s4151_s3 + $0x4] ss:$8 sps:$4 sm:$0xff] (!%p291_p2)   ;;  %v3121_v11 = vld [vmem:[%s4151_s3 + $0x14] ss:$8 sps:$4 sm:$0xff] (!%p291_p2)   ;;  %v3119_v15 = vld [vmem:[%s4151_s3 + $0x10] ss:$8 sps:$4 sm:$0xff] (!%p291_p2)  }
   0xb   : > { %2691 = vmatprep.subr.msk.bf16.mxu1 (!%p291_p2), %vm476_vm0, %v3113_v5  ;;  %3109 = vset.pattern.permute.xlu0 (!%p291_p2), %v3244_v3  ;;  %v3115_v12 = vld [vmem:[%s4149_s1 + $0x8] ss:$16 sps:$4 sm:$0x7f] (!%p291_p2)   ;;  %v3124_v20 = vld [vmem:[%s4151_s3 + $0x24] ss:$8 sps:$4 sm:$0xff] (!%p291_p2)   ;;  %s2669_s15 = sshll.u32 (!%p291_p2), %s2662_s12, 1 }
   0xc   : > { %1591 = vmatprep.subr.bf16.mxu0 (!%p291_p2), %v3118_v6  ;;  %v484_v19 = vsel (!%p291_p2), %vm476_vm0, %v3115_v12, 0  ;;  %v3122_v22 = vld [vmem:[%s4151_s3 + $0x20] ss:$8 sps:$4 sm:$0xff] (!%p291_p2)   ;;  %v3127_v26 = vld [vmem:[%s4151_s3 + $0x34] ss:$8 sps:$4 sm:$0xff] (!%p291_p2)   ;;  %p332_p4 = scmp.lt.s32.totalorder (!%p291_p2), %s2669_s15, 3 }
   0xd   : > { %v3125_v29 = vld [vmem:[%s4151_s3 + $0x30] ss:$8 sps:$4 sm:$0xff] (!%p291_p2)   ;;  %v3130_v30 = vld [vmem:[%s4151_s3 + $0x44] ss:$8 sps:$4 sm:$0xff] (!%p291_p2)   ;;  %v3128_v34 = vld [vmem:[%s4151_s3 + $0x40] ss:$8 sps:$4 sm:$0xff] (!%p291_p2)  }
   0xe   : > { %v3133_v35 = vld [vmem:[%s4151_s3 + $0x54] ss:$8 sps:$4 sm:$0xff] (!%p291_p2)   ;;  %v3131_v39 = vld [vmem:[%s4151_s3 + $0x50] ss:$8 sps:$4 sm:$0xff] (!%p291_p2)   ;;  %v3136_v40 = vld [vmem:[%s4151_s3 + $0x64] ss:$8 sps:$4 sm:$0xff] (!%p291_p2)  }
   0xf   : > { %s4159_s16 = smov (!%p326_p3, %s2667_s16), 63  ;;  %v3134_v44 = vld [vmem:[%s4151_s3 + $0x60] ss:$8 sps:$4 sm:$0xff]   ;;  %v3139_v45 = vld [vmem:[%s4151_s3 + $0x74] ss:$8 sps:$4 sm:$0xff]   ;;  %s4161_s15 = smov (!%p332_p4, %s2669_s15), 3 }
  0x10   : > { %s2668_s21 = sshll.u32 %s4159_s16, 3  ;;  %v3137_v48 = vld [vmem:[%s4151_s3 + $0x70] ss:$8 sps:$4 sm:$0xff]   ;;  %v3142_v49 = vld [vmem:[%s4151_s3 + $0x84] ss:$8 sps:$4 sm:$0xff]   ;;  %s334_s18 = scalar_lea.vmem %s4157_s9, %s4161_s15 }
  0x11   : > { %s3331_s24 = scalar_lea.vmem %s4148_s0, %s2668_s21  ;;  %v3140_v51 = vld [vmem:[%s4151_s3 + $0x80] ss:$8 sps:$4 sm:$0xff]   ;;  %v3145_v55 = vld [vmem:[%s4151_s3 + $0x94] ss:$8 sps:$4 sm:$0xff]   ;;  %v3143_v58 = vld [vmem:[%s4151_s3 + $0x90] ss:$8 sps:$4 sm:$0xff]  }
  0x12   : > { %v337_v7 = vld [vmem:[%s3331_s24] sm:$0xff]  ;;  %v338_v8 = vld [vmem:[%s3331_s24 + $0x8] sm:$0xff]  ;;  %v339_v13 = vld [vmem:[%s3331_s24 + $0x10] sm:$0xff] }
  0x13   : > { %v3338_v10 = vpack.c.bf16 %v338_v8, %v337_v7  ;;  %v340_v14 = vld [vmem:[%s3331_s24 + $0x18] sm:$0xff]  ;;  %v353_v16 = vld [vmem:[%s3331_s24 + $0x80] sm:$0xff]  ;;  %v354_v17 = vld [vmem:[%s3331_s24 + $0x88] sm:$0xff] }
  0x14   : > { %v3356_v18 = vpack.c.bf16 %v354_v17, %v353_v16  ;;  %v3362_v21 = vpack.c.bf16 %v340_v14, %v339_v13  ;;  %v355_v23 = vld [vmem:[%s3331_s24 + $0x90] sm:$0xff]  ;;  %v356_v24 = vld [vmem:[%s3331_s24 + $0x98] sm:$0xff]  ;;  %v341_v25 = vld [vmem:[%s3331_s24 + $0x20] sm:$0xff] }
  0x15   : > { %2675 = vmatmul.mubr.msk.bf16.vlgmr.msra.gmra.mrb[0].mxu0 %vm427_vm1, %v3338_v10  ;;  %v342_v27 = vld [vmem:[%s3331_s24 + $0x28] sm:$0xff]  ;;  %v3380_v28 = vpack.c.bf16 %v356_v24, %v355_v23  ;;  %v357_v32 = vld [vmem:[%s3331_s24 + $0xa0] sm:$0xff]  ;;  %v343_v36 = vld [vmem:[%s3331_s24 + $0x30] sm:$0xff] }
  0x16   : > { %531 = vmatprep.mubr.bf16.mxu0 %v3244_v3  ;;  %1592 = vmatpush1.bf16.msra.mxu0 %v3116_v9  ;;  %v3388_v31 = vpack.c.bf16 %v342_v27, %v341_v25  ;;  %v358_v33 = vld [vmem:[%s3331_s24 + $0xa8] sm:$0xff]  ;;  %v344_v37 = vld [vmem:[%s3331_s24 + $0x38] sm:$0xff]  ;;  %v359_v42 = vld [vmem:[%s3331_s24 + $0xb0] sm:$0xff] }
  0x17   : > { %1593 = vmatprep.subr.bf16.mxu0 %v3121_v11  ;;  %2683 = vmatmul.mubr.msk.bf16.vlgmr.msra.gmra.mrb[0].mxu1 %vm427_vm1, %v3356_v18  ;;  %v3406_v38 = vpack.c.bf16 %v358_v33, %v357_v32  ;;  %v3414_v41 = vpack.c.bf16 %v344_v37, %v343_v36  ;;  %v360_v43 = vld [vmem:[%s3331_s24 + $0xb8] sm:$0xff]  ;;  %v345_v46 = vld [vmem:[%s3331_s24 + $0x40] sm:$0xff]  ;;  %v346_v47 = vld [vmem:[%s3331_s24 + $0x48] sm:$0xff] }
  0x18   : > { %611 = vmatprep.mubr.bf16.mxu1 %v3244_v3  ;;  %683 = vmatpush1.bf16.msra.mxu1 %v484_v19  ;;  %v3438_v50 = vpack.c.bf16 %v360_v43, %v359_v42  ;;  %v3443_v52 = vpack.c.bf16 %v346_v47, %v345_v46  ;;  %v361_v53 = vld [vmem:[%s3331_s24 + $0xc0] sm:$0xff]  ;;  %v362_v54 = vld [vmem:[%s3331_s24 + $0xc8] sm:$0xff]  ;;  %v347_v56 = vld [vmem:[%s3331_s24 + $0x50] sm:$0xff] }
  0x19   : > { %v348_v57 = vld [vmem:[%s3331_s24 + $0x58] sm:$0xff]  ;;  %v3148_v59 = vld [vmem:[%s4151_s3 + $0xa4] ss:$8 sps:$4 sm:$0xff]   ;;  %v3464_v60 = vpack.c.bf16 %v362_v54, %v361_v53  ;;  %v3146_v61 = vld [vmem:[%s4151_s3 + $0xa0] ss:$8 sps:$4 sm:$0xff]  }
  0x1a   : > { %1594 = vmatpush1.bf16.msra.mxu0 %v3119_v15  ;;  %v374_v62 = vpack.c.bf16 %v348_v57, %v347_v56  ;;  %v363_v63 = vld [vmem:[%s3331_s24 + $0xd0] sm:$0xff]  ;;  %v364_v0 = vld [vmem:[%s3331_s24 + $0xd8] sm:$0xff]  ;;  %v349_v2 = vld [vmem:[%s3331_s24 + $0x60] sm:$0xff] }
  0x1b   : > { %1595 = vmatprep.subr.bf16.mxu0 %v3124_v20  ;;  %v3151_v1 = vld [vmem:[%s4151_s3 + $0xb4] ss:$8 sps:$4 sm:$0xff]   ;;  %v350_v4 = vld [vmem:[%s3331_s24 + $0x68] sm:$0xff]  ;;  %v3149_v5 = vld [vmem:[%s4151_s3 + $0xb0] ss:$8 sps:$4 sm:$0xff]   ;;  %v3487_v7 = vpack.c.bf16 %v364_v0, %v363_v63 }
  0x1c   : > { %v3154_v6 = vld [vmem:[%s4151_s3 + $0xc4] ss:$8 sps:$4 sm:$0xff]   ;;  %v375_v8 = vpack.c.bf16 %v350_v4, %v349_v2  ;;  %v3152_v9 = vld [vmem:[%s4151_s3 + $0xc0] ss:$8 sps:$4 sm:$0xff]   ;;  %v351_v13 = vld [vmem:[%s3331_s24 + $0x70] sm:$0xff] }
  0x1d   : > { %2676 = vmatmul.mubr.msk.bf16.gmra.mrb[4].mxu0 %vm427_vm1, %v3362_v21  ;;  %v365_v11 = vld [vmem:[%s3331_s24 + $0xe0] sm:$0xff]  ;;  %v366_v12 = vld [vmem:[%s3331_s24 + $0xe8] sm:$0xff]  ;;  %v352_v14 = vld [vmem:[%s3331_s24 + $0x78] sm:$0xff] }
  0x1e   : > { %541 = vmatprep.mubr.bf16.mxu0 %v3244_v3  ;;  %1596 = vmatpush1.bf16.msra.mxu0 %v3122_v22  ;;  %v383_v15 = vpack.c.bf16 %v366_v12, %v365_v11  ;;  %v376_v16 = vpack.c.bf16 %v352_v14, %v351_v13  ;;  %v367_v17 = vld [vmem:[%s3331_s24 + $0xf0] sm:$0xff]  ;;  %v368_v19 = vld [vmem:[%s3331_s24 + $0xf8] sm:$0xff] }
  0x1f   : > { %1597 = vmatprep.subr.bf16.mxu0 %v3127_v26  ;;  %2684 = vmatmul.mubr.msk.bf16.gmra.mrb[4].mxu1 %vm427_vm1, %v3380_v28  ;;  %v384_v20 = vpack.c.bf16 %v368_v19, %v367_v17  ;;  %v3157_v22 = vld [vmem:[%s4151_s3 + $0xd4] ss:$8 sps:$4 sm:$0xff]   ;;  %v3155_v23 = vld [vmem:[%s4151_s3 + $0xd0] ss:$8 sps:$4 sm:$0xff]   ;;  %v391_v26 = vlaneseq }
  0x20   : > { %621 = vmatprep.mubr.bf16.mxu1 %v3244_v3  ;;  %v3163_v24 = vld [vmem:[%s4151_s3 + $0xf4] ss:$8 sps:$4 sm:$0xff]   ;;  %v3161_v25 = vld [vmem:[%s4151_s3 + $0xf0] ss:$8 sps:$4 sm:$0xff]  }
  0x21   : > { %v3572_v27 = vshrl.u32 %v391_v26, 7  ;;  %vm2609_vm2 = vcmp.lt.s32.totalorder %v391_v26, 256 }
  0x22   : > { %1598 = vmatpush1.bf16.msra.mxu0 %v3125_v29  ;;  %v3580_v29 = vld [vmem:[%s4150_s2] sm:$0xf] }
  0x23   : > { %1599 = vmatprep.subr.bf16.mxu0 %v3130_v30  ;;  %v397_v30 = vsub.s32 1, %v3572_v27 }
  0x25   : > { %2677 = vmatmul.mubr.msk.bf16.gmra.mrb[8].mxu0 %vm427_vm1, %v3388_v31 }
  0x26   : > { %551 = vmatprep.mubr.bf16.mxu0 %v3244_v3  ;;  %1600 = vmatpush1.bf16.msra.mxu0 %v3128_v34 }
  0x27   : > { %1601 = vmatprep.subr.bf16.mxu0 %v3133_v35  ;;  %2685 = vmatmul.mubr.msk.bf16.gmra.mrb[8].mxu1 %vm427_vm1, %v3406_v38 }
  0x28   : > { %631 = vmatprep.mubr.bf16.mxu1 %v3244_v3 }
  0x2a   : > { %1602 = vmatpush1.bf16.msra.mxu0 %v3131_v39 }
  0x2b   : > { %1603 = vmatprep.subr.bf16.mxu0 %v3136_v40 }
  0x2d   : > { %2678 = vmatmul.mubr.msk.bf16.gmra.mrb[12].mxu0 %vm427_vm1, %v3414_v41 }
  0x2e   : > { %561 = vmatprep.mubr.bf16.mxu0 %v3244_v3  ;;  %1604 = vmatpush1.bf16.msra.mxu0 %v3134_v44 }
  0x2f   : > { %1605 = vmatprep.subr.bf16.mxu0 %v3139_v45  ;;  %2686 = vmatmul.mubr.msk.bf16.gmra.mrb[12].mxu1 %vm427_vm1, %v3438_v50 }
  0x30   : > { %641 = vmatprep.mubr.bf16.mxu1 %v3244_v3 }
  0x32   : > { %1606 = vmatpush1.bf16.msra.mxu0 %v3137_v48 }
  0x33   : > { %1607 = vmatprep.subr.bf16.mxu0 %v3142_v49 }
  0x35   : > { %2679 = vmatmul.mubr.msk.bf16.gmra.mrb[16].mxu0 %vm427_vm1, %v3443_v52 }
  0x36   : > { %571 = vmatprep.mubr.bf16.mxu0 %v3244_v3  ;;  %1608 = vmatpush1.bf16.msra.mxu0 %v3140_v51 }
  0x37   : > { %1609 = vmatprep.subr.bf16.mxu0 %v3145_v55  ;;  %2687 = vmatmul.mubr.msk.bf16.gmra.mrb[16].mxu1 %vm427_vm1, %v3464_v60 }
  0x38   : > { %651 = vmatprep.mubr.bf16.mxu1 %v3244_v3 }
  0x3a   : > { %1610 = vmatpush1.bf16.msra.mxu0 %v3143_v58 }
  0x3b   : > { %1611 = vmatprep.subr.bf16.mxu0 %v3148_v59 }
  0x3d   : > { %2680 = vmatmul.mubr.msk.bf16.gmra.mrb[20].mxu0 %vm427_vm1, %v374_v62 }
  0x3e   : > { %581 = vmatprep.mubr.bf16.mxu0 %v3244_v3  ;;  %1612 = vmatpush1.bf16.msra.mxu0 %v3146_v61 }
  0x3f   : > { %1613 = vmatprep.subr.bf16.mxu0 %v3151_v1  ;;  %2688 = vmatmul.mubr.msk.bf16.gmra.mrb[20].mxu1 %vm427_vm1, %v3487_v7 }
  0x40   : > { %661 = vmatprep.mubr.bf16.mxu1 %v3244_v3 }
  0x42   : > { %1614 = vmatpush1.bf16.msra.mxu0 %v3149_v5  ;;  %v3169_v5 = vld [vmem:[%s4151_s3 + $0x114] ss:$8 sps:$4 sm:$0xff]  }
  0x43   : > { %1615 = vmatprep.subr.bf16.mxu0 %v3154_v6 }
  0x45   : > { %2681 = vmatmul.mubr.msk.bf16.gmra.mrb[24].mxu0 %vm427_vm1, %v375_v8 }
  0x46   : > { %591 = vmatprep.mubr.bf16.mxu0 %v3244_v3  ;;  %1616 = vmatpush1.bf16.msra.mxu0 %v3152_v9 }
  0x47   : > { %2689 = vmatmul.mubr.msk.bf16.gmra.mrb[24].mxu1 %vm427_vm1, %v383_v15  ;;  %1617 = vmatprep.subr.bf16.mxu0 %v3157_v22 }
  0x48   : > { %671 = vmatprep.mubr.bf16.mxu1 %v3244_v3 }
  0x4a   : > { %1618 = vmatpush1.bf16.msra.mxu0 %v3155_v23 }
  0x4d   : > { %2682 = vmatmul.mubr.msk.bf16.gmra.mrb[28].mxu0 %vm427_vm1, %v376_v16 }
  0x4f   : > { %2690 = vmatmul.mubr.msk.bf16.gmra.mrb[28].mxu1 %vm427_vm1, %v384_v20 }
  0x50   : > { %714 = vmatprep.mubr.bf16.mxu1 %v3244_v3 }
  0x57   : > { %2692 = vmatmul.mubr.msk.bf16.vlgmr.msra.gmra.mrb[32].mxu1 %vm427_vm1, %v3338_v10  ;;  %v3160_v10 = vld [vmem:[%s4151_s3 + $0xe4] ss:$8 sps:$4 sm:$0xff]  }
  0x58   : > { %724 = vmatprep.mubr.bf16.mxu1 %v3244_v3  ;;  %1619 = vmatprep.subr.bf16.mxu0 %v3160_v10  ;;  %v3167_v10 = vld [vmem:[%s4151_s3 + $0x110] ss:$8 sps:$4 sm:$0xff]  }
  0x5f   : > { %2693 = vmatmul.mubr.msk.bf16.gmra.mrb[36].mxu1 %vm427_vm1, %v3362_v21  ;;  %v3158_v21 = vld [vmem:[%s4151_s3 + $0xe0] ss:$8 sps:$4 sm:$0xff]  }
  0x60   : > { %734 = vmatprep.mubr.bf16.mxu1 %v3244_v3  ;;  %1620 = vmatpush1.bf16.msra.mxu0 %v3158_v21 }
  0x61   : > { %1621 = vmatprep.subr.bf16.mxu0 %v3163_v24 }
  0x64   : > { %1622 = vmatpush1.bf16.msra.mxu0 %v3161_v25 }
  0x67   : > { %2694 = vmatmul.mubr.msk.bf16.gmra.mrb[40].mxu1 %vm427_vm1, %v3388_v31 }
  0x68   : > { %744 = vmatprep.mubr.bf16.mxu1 %v3244_v3 }
  0x6f   : > { %2695 = vmatmul.mubr.msk.bf16.gmra.mrb[44].mxu1 %vm427_vm1, %v3414_v41 }
  0x70   : > { %754 = vmatprep.mubr.bf16.mxu1 %v3244_v3 }
  0x77   : > { %2696 = vmatmul.mubr.msk.bf16.gmra.mrb[48].mxu1 %vm427_vm1, %v3443_v52 }
  0x78   : > { %764 = vmatprep.mubr.bf16.mxu1 %v3244_v3 }
  0x7f   : > { %2697 = vmatmul.mubr.msk.bf16.gmra.mrb[52].mxu1 %vm427_vm1, %v374_v62  ;;  %v3164_v62 = vld [vmem:[%s4151_s3 + $0x100] ss:$8 sps:$4 sm:$0xff]  }
  0x80   : > { %774 = vmatprep.mubr.bf16.mxu1 %v3244_v3 }
  0x87   : > { %2698 = vmatmul.mubr.msk.bf16.gmra.mrb[56].mxu1 %vm427_vm1, %v375_v8 }
  0x88   : > { %784 = vmatprep.mubr.bf16.mxu1 %v3244_v3 }
  0x8f   : > { %2699 = vmatmul.mubr.msk.bf16.gmra.mrb[60].mxu1 %vm427_vm1, %v376_v16 }
  0x90   : > { %794 = vmatprep.mubr.bf16.mxu1 %v3244_v3 }
  0x97   : > { %2700 = vmatmul.mubr.msk.bf16.gmra.mrb[64].mxu1 %vm427_vm1, %v3356_v18  ;;  %v3166_v18 = vld [vmem:[%s4151_s3 + $0x104] ss:$8 sps:$4 sm:$0xff]  }
  0x98   : > { %804 = vmatprep.mubr.bf16.mxu1 %v3244_v3  ;;  %1784 = vmatprep.subr.bf16.mxu0 %v3166_v18 }
  0x9f   : > { %2701 = vmatmul.mubr.msk.bf16.gmra.mrb[68].mxu1 %vm427_vm1, %v3380_v28  ;;  %v3575_v28 = vsub.s32 0, %v3572_v27 }
  0xa0   : > { %814 = vmatprep.mubr.bf16.mxu1 %v3244_v3 }
  0xa1   : > { %v3585_v31 = vrot.slane %v3580_v29, %v3575_v28 }
  0xa7   : > { %2702 = vmatmul.mubr.msk.bf16.gmra.mrb[72].mxu1 %vm427_vm1, %v3406_v38 }
  0xa8   : > { %824 = vmatprep.mubr.bf16.mxu1 %v3244_v3 }
  0xaf   : > { %2703 = vmatmul.mubr.msk.bf16.gmra.mrb[76].mxu1 %vm427_vm1, %v3438_v50 }
  0xb0   : > { %834 = vmatprep.mubr.bf16.mxu1 %v3244_v3 }
  0xb7   : > { %2704 = vmatmul.mubr.msk.bf16.gmra.mrb[80].mxu1 %vm427_vm1, %v3464_v60 }
  0xb8   : > { %844 = vmatprep.mubr.bf16.mxu1 %v3244_v3 }
  0xbf   : > { %2705 = vmatmul.mubr.msk.bf16.gmra.mrb[84].mxu1 %vm427_vm1, %v3487_v7 }
  0xc0   : > { %854 = vmatprep.mubr.bf16.mxu1 %v3244_v3 }
  0xc7   : > { %2706 = vmatmul.mubr.msk.bf16.gmra.mrb[88].mxu1 %vm427_vm1, %v383_v15 }
  0xc8   : > { %864 = vmatprep.mubr.bf16.mxu1 %v3244_v3  ;;  %v3590_v3 = vrot.slane %v3580_v29, %v397_v30 }
  0xcf   : > { %2707 = vmatmul.mubr.msk.bf16.gmra.mrb[92].mxu1 %vm427_vm1, %v384_v20 }
  0xe8   : > { %v523_v32 = vpop.f32.mrb[0].mxu0 }
  0xe9   : > { %v524_v33 = vadd.f32 %v523_v32, %v3585_v31  ;;  %v525_v34 = vpop.f32.mrb[1].mxu0 }
  0xea   : > { %v526_v35 = vadd.f32 %v525_v34, %v3590_v3  ;;  %v527_v36 = vpop.f32.mrb[2].mxu0  ;;  %v603_v43 = vpop.f32.mrb[0].mxu1 }
  0xeb   : > { %v875_v37 = vmul.f32 0.2, %v524_v33  ;;  %v528_v38 = vadd.f32 %v527_v36, %v3585_v31  ;;  %v529_v39 = vpop.f32.mrb[3].mxu0  ;;  %v604_v45 = vadd.f32 %v603_v43, %v3585_v31  ;;  %v605_v46 = vpop.f32.mrb[1].mxu1 }
  0xec   : > { %v876_v40 = vmul.f32 0.2, %v526_v35  ;;  %v530_v41 = vadd.f32 %v529_v39, %v3590_v3  ;;  %v606_v49 = vadd.f32 %v605_v46, %v3590_v3  ;;  %v607_v50 = vpop.f32.mrb[2].mxu1 }
  0xed   : > { %v879_v42 = vmul.f32 0.2, %v528_v38  ;;  %v1003_v47 = vmax.f32 %v524_v33, %v875_v37  ;;  %v939_v54 = vmul.f32 0.2, %v604_v45  ;;  %v608_v55 = vadd.f32 %v607_v50, %v3585_v31  ;;  %v609_v56 = vpop.f32.mrb[3].mxu1 }
  0xee   : > { %v880_v44 = vmul.f32 0.2, %v530_v41  ;;  %v1004_v51 = vmax.f32 %v526_v35, %v876_v40  ;;  %v940_v60 = vmul.f32 0.2, %v606_v49  ;;  %v610_v61 = vadd.f32 %v609_v56, %v3590_v3  ;;  %v3172_v33 = vld [vmem:[%s4151_s3 + $0x124] ss:$8 sps:$4 sm:$0xff]  }
  0xef   : > { %v1007_v48 = vmax.f32 %v528_v38, %v879_v42  ;;  %v1067_v2 = vmax.f32 %v604_v45, %v939_v54  ;;  %v943_v4 = vmul.f32 0.2, %v608_v55  ;;  %v3170_v45 = vld [vmem:[%s4151_s3 + $0x120] ss:$8 sps:$4 sm:$0xff]  }
  0xf0   : > { %v1008_v52 = vmax.f32 %v530_v41, %v880_v44  ;;  %v533_v53 = vpop.f32.mrb[4].mxu0  ;;  %v1068_v9 = vmax.f32 %v606_v49, %v940_v60  ;;  %v944_v11 = vmul.f32 0.2, %v610_v61 }
  0xf1   : > { %v1131_v57 = vpack.c.bf16 %v1007_v48, %v1003_v47  ;;  %v534_v58 = vadd.f32 %v533_v53, %v3585_v31  ;;  %v535_v59 = vpop.f32.mrb[5].mxu0  ;;  %v1071_v14 = vmax.f32 %v608_v55, %v943_v4  ;;  %v3173_v4 = vld [vmem:[%s4151_s3 + $0x130] ss:$8 sps:$4 sm:$0xff]  }
  0xf2   : > { %v536_v63 = vadd.f32 %v535_v59, %v3590_v3  ;;  %v537_v0 = vpop.f32.mrb[6].mxu0  ;;  %v1132_v1 = vpack.c.bf16 %v1008_v52, %v1004_v51  ;;  %v1072_v16 = vmax.f32 %v610_v61, %v944_v11  ;;  %v613_v17 = vpop.f32.mrb[4].mxu1  ;;  %v3175_v51 = vld [vmem:[%s4151_s3 + $0x134] ss:$8 sps:$4 sm:$0xff]   ;;  %v3178_v11 = vld [vmem:[%s4151_s3 + $0x144] ss:$8 sps:$4 sm:$0xff]  }
  0xf3   : > { %v883_v6 = vmul.f32 0.2, %v534_v58  ;;  %v538_v7 = vadd.f32 %v537_v0, %v3585_v31  ;;  %v539_v8 = vpop.f32.mrb[7].mxu0  ;;  %v614_v20 = vadd.f32 %v613_v17, %v3585_v31  ;;  %v615_v22 = vpop.f32.mrb[5].mxu1  ;;  %v3611_v23 = vpack.c.bf16 %v1071_v14, %v1067_v2 }
  0xf4   : > { %v884_v12 = vmul.f32 0.2, %v536_v63  ;;  %v540_v13 = vadd.f32 %v539_v8, %v3590_v3  ;;  %1623 = vmatprep.mubr.bf16.mxu0 %v1132_v1  ;;  %v616_v25 = vadd.f32 %v615_v22, %v3590_v3  ;;  %v617_v18 = vpop.f32.mrb[6].mxu1  ;;  %v3617_v32 = vpack.c.bf16 %v1072_v16, %v1068_v9 }
  0xf5   : > { %v887_v15 = vmul.f32 0.2, %v538_v7  ;;  %1624 = vmatmul.mubr.bf16.vlgmr.msra.gmra.mrb[32].mxu0 %v1131_v57  ;;  %v1011_v21 = vmax.f32 %v534_v58, %v883_v6  ;;  %v947_v37 = vmul.f32 0.2, %v614_v20  ;;  %v618_v38 = vadd.f32 %v617_v18, %v3585_v31  ;;  %v619_v39 = vpop.f32.mrb[7].mxu1 }
  0xf6   : > { %v888_v19 = vmul.f32 0.2, %v540_v13  ;;  %1785 = vmatpush1.bf16.msra.mxu0 %v3164_v62  ;;  %v1012_v34 = vmax.f32 %v536_v63, %v884_v12  ;;  %v948_v43 = vmul.f32 0.2, %v616_v25  ;;  %v620_v44 = vadd.f32 %v619_v39, %v3590_v3 }
  0xf7   : > { %v1015_v24 = vmax.f32 %v538_v7, %v887_v15  ;;  %1786 = vmatprep.subr.bf16.mxu0 %v3169_v5  ;;  %v1075_v49 = vmax.f32 %v614_v20, %v947_v37  ;;  %v951_v50 = vmul.f32 0.2, %v618_v38 }
  0xf8   : > { %v1016_v35 = vmax.f32 %v540_v13, %v888_v19  ;;  %v543_v36 = vpop.f32.mrb[8].mxu0  ;;  %v1076_v55 = vmax.f32 %v616_v25, %v948_v43  ;;  %v952_v56 = vmul.f32 0.2, %v620_v44 }
  0xf9   : > { %v544_v40 = vadd.f32 %v543_v36, %v3585_v31  ;;  %v545_v41 = vpop.f32.mrb[9].mxu0  ;;  %v1135_v42 = vpack.c.bf16 %v1015_v24, %v1011_v21  ;;  %v1079_v59 = vmax.f32 %v618_v38, %v951_v50  ;;  %v3176_v24 = vld [vmem:[%s4151_s3 + $0x140] ss:$8 sps:$4 sm:$0xff]   ;;  %v3181_v36 = vld [vmem:[%s4151_s3 + $0x154] ss:$8 sps:$4 sm:$0xff]  }
  0xfa   : > { %v546_v46 = vadd.f32 %v545_v41, %v3590_v3  ;;  %v547_v47 = vpop.f32.mrb[10].mxu0  ;;  %v1136_v48 = vpack.c.bf16 %v1016_v35, %v1012_v34  ;;  %1787 = vmatpush1.bf16.msra.mxu0 %v3167_v10  ;;  %v1080_v61 = vmax.f32 %v620_v44, %v952_v56  ;;  %v623_v62 = vpop.f32.mrb[8].mxu1 }
  0xfb   : > { %v891_v52 = vmul.f32 0.2, %v544_v40  ;;  %v548_v53 = vadd.f32 %v547_v47, %v3585_v31  ;;  %v549_v54 = vpop.f32.mrb[11].mxu0  ;;  %1788 = vmatprep.subr.bf16.mxu0 %v3172_v33  ;;  %v624_v0 = vadd.f32 %v623_v62, %v3585_v31  ;;  %v625_v1 = vpop.f32.mrb[9].mxu1  ;;  %v3635_v2 = vpack.c.bf16 %v1079_v59, %v1075_v49 }
  0xfc   : > { %v892_v57 = vmul.f32 0.2, %v546_v46  ;;  %v550_v58 = vadd.f32 %v549_v54, %v3590_v3  ;;  %1633 = vmatprep.mubr.bf16.mxu0 %v1136_v48  ;;  %v626_v7 = vadd.f32 %v625_v1, %v3590_v3  ;;  %v627_v8 = vpop.f32.mrb[10].mxu1  ;;  %v3641_v9 = vpack.c.bf16 %v1080_v61, %v1076_v55 }
  0xfd   : > { %v895_v60 = vmul.f32 0.2, %v548_v53  ;;  %1634 = vmatmul.mubr.bf16.gmra.mrb[36].mxu0 %v1135_v42  ;;  %v1019_v5 = vmax.f32 %v544_v40, %v891_v52  ;;  %v955_v15 = vmul.f32 0.2, %v624_v0  ;;  %v628_v16 = vadd.f32 %v627_v8, %v3585_v31  ;;  %v629_v17 = vpop.f32.mrb[11].mxu1 }
  0xfe   : > { %v896_v63 = vmul.f32 0.2, %v550_v58  ;;  %1789 = vmatpush1.bf16.msra.mxu0 %v3170_v45  ;;  %v1020_v12 = vmax.f32 %v546_v46, %v892_v57  ;;  %v956_v10 = vmul.f32 0.2, %v626_v7  ;;  %v630_v21 = vadd.f32 %v629_v17, %v3590_v3  ;;  %v3179_v52 = vld [vmem:[%s4151_s3 + $0x150] ss:$8 sps:$4 sm:$0xff]  }
  0xff   : > { %v1023_v6 = vmax.f32 %v548_v53, %v895_v60  ;;  %1790 = vmatprep.subr.bf16.mxu0 %v3175_v51  ;;  %v1083_v34 = vmax.f32 %v624_v0, %v955_v15  ;;  %v959_v35 = vmul.f32 0.2, %v628_v16  ;;  %v3182_v8 = vld [vmem:[%s4151_s3 + $0x160] ss:$8 sps:$4 sm:$0xff]  }
 0x100   : > { %v1024_v13 = vmax.f32 %v550_v58, %v896_v63  ;;  %v553_v14 = vpop.f32.mrb[12].mxu0  ;;  %v1084_v40 = vmax.f32 %v626_v7, %v956_v10  ;;  %v960_v41 = vmul.f32 0.2, %v630_v21  ;;  %v3184_v58 = vld [vmem:[%s4151_s3 + $0x164] ss:$8 sps:$4 sm:$0xff]  }
 0x101   : > { %v554_v19 = vadd.f32 %v553_v14, %v3585_v31  ;;  %v555_v20 = vpop.f32.mrb[13].mxu0  ;;  %v1139_v22 = vpack.c.bf16 %v1023_v6, %v1019_v5  ;;  %v1087_v44 = vmax.f32 %v628_v16, %v959_v35  ;;  %v3187_v16 = vld [vmem:[%s4151_s3 + $0x174] ss:$8 sps:$4 sm:$0xff]  }
 0x102   : > { %v556_v25 = vadd.f32 %v555_v20, %v3590_v3  ;;  %v557_v18 = vpop.f32.mrb[14].mxu0  ;;  %v1140_v33 = vpack.c.bf16 %v1024_v13, %v1020_v12  ;;  %1791 = vmatpush1.bf16.msra.mxu0 %v3173_v4  ;;  %v1088_v46 = vmax.f32 %v630_v21, %v960_v41  ;;  %v633_v47 = vpop.f32.mrb[12].mxu1 }
 0x103   : > { %v899_v37 = vmul.f32 0.2, %v554_v19  ;;  %v558_v38 = vadd.f32 %v557_v18, %v3585_v31  ;;  %v559_v39 = vpop.f32.mrb[15].mxu0  ;;  %1792 = vmatprep.subr.bf16.mxu0 %v3178_v11  ;;  %v634_v49 = vadd.f32 %v633_v47, %v3585_v31  ;;  %v635_v50 = vpop.f32.mrb[13].mxu1  ;;  %v3659_v51 = vpack.c.bf16 %v1087_v44, %v1083_v34 }
 0x104   : > { %v900_v42 = vmul.f32 0.2, %v556_v25  ;;  %v560_v43 = vadd.f32 %v559_v39, %v3590_v3  ;;  %1643 = vmatprep.mubr.bf16.mxu0 %v1140_v33  ;;  %v636_v55 = vadd.f32 %v635_v50, %v3590_v3  ;;  %v637_v56 = vpop.f32.mrb[14].mxu1  ;;  %v3665_v57 = vpack.c.bf16 %v1088_v46, %v1084_v40  ;;  %v3185_v39 = vld [vmem:[%s4151_s3 + $0x170] ss:$8 sps:$4 sm:$0xff]  }
 0x105   : > { %v903_v45 = vmul.f32 0.2, %v558_v38  ;;  %1644 = vmatmul.mubr.bf16.gmra.mrb[40].mxu0 %v1139_v22  ;;  %v1027_v53 = vmax.f32 %v554_v19, %v899_v37  ;;  %v963_v62 = vmul.f32 0.2, %v634_v49  ;;  %v638_v63 = vadd.f32 %v637_v56, %v3585_v31  ;;  %v639_v0 = vpop.f32.mrb[15].mxu1 }
 0x106   : > { %v904_v48 = vmul.f32 0.2, %v560_v43  ;;  %1793 = vmatpush1.bf16.msra.mxu0 %v3176_v24  ;;  %v1028_v59 = vmax.f32 %v556_v25, %v900_v42  ;;  %v964_v6 = vmul.f32 0.2, %v636_v55  ;;  %v640_v7 = vadd.f32 %v639_v0, %v3590_v3 }
 0x107   : > { %v1031_v54 = vmax.f32 %v558_v38, %v903_v45  ;;  %1794 = vmatprep.subr.bf16.mxu0 %v3181_v36  ;;  %v1091_v14 = vmax.f32 %v634_v49, %v963_v62  ;;  %v967_v15 = vmul.f32 0.2, %v638_v63  ;;  %v3190_v45 = vld [vmem:[%s4151_s3 + $0x184] ss:$8 sps:$4 sm:$0xff]  }
 0x108   : > { %v1032_v60 = vmax.f32 %v560_v43, %v904_v48  ;;  %v563_v61 = vpop.f32.mrb[16].mxu0  ;;  %v1092_v22 = vmax.f32 %v636_v55, %v964_v6  ;;  %v968_v10 = vmul.f32 0.2, %v640_v7 }
 0x109   : > { %v564_v1 = vadd.f32 %v563_v61, %v3585_v31  ;;  %v565_v4 = vpop.f32.mrb[17].mxu0  ;;  %v1143_v5 = vpack.c.bf16 %v1031_v54, %v1027_v53  ;;  %v1095_v25 = vmax.f32 %v638_v63, %v967_v15 }
 0x10a   : > { %v566_v11 = vadd.f32 %v565_v4, %v3590_v3  ;;  %v567_v12 = vpop.f32.mrb[18].mxu0  ;;  %v1144_v13 = vpack.c.bf16 %v1032_v60, %v1028_v59  ;;  %1795 = vmatpush1.bf16.msra.mxu0 %v3179_v52  ;;  %v1096_v33 = vmax.f32 %v640_v7, %v968_v10  ;;  %v643_v34 = vpop.f32.mrb[16].mxu1  ;;  %v3188_v59 = vld [vmem:[%s4151_s3 + $0x180] ss:$8 sps:$4 sm:$0xff]   ;;  %v3191_v10 = vld [vmem:[%s4151_s3 + $0x190] ss:$8 sps:$4 sm:$0xff]  }
 0x10b   : > { %v907_v17 = vmul.f32 0.2, %v564_v1  ;;  %v568_v19 = vadd.f32 %v567_v12, %v3585_v31  ;;  %v569_v20 = vpop.f32.mrb[19].mxu0  ;;  %1796 = vmatprep.subr.bf16.mxu0 %v3184_v58  ;;  %v644_v36 = vadd.f32 %v643_v34, %v3585_v31  ;;  %v645_v37 = vpop.f32.mrb[17].mxu1  ;;  %v3683_v38 = vpack.c.bf16 %v1095_v25, %v1091_v14  ;;  %v3196_v34 = vld [vmem:[%s4151_s3 + $0x1a4] ss:$8 sps:$4 sm:$0xff]  }
 0x10c   : > { %v908_v21 = vmul.f32 0.2, %v566_v11  ;;  %v570_v24 = vadd.f32 %v569_v20, %v3590_v3  ;;  %1653 = vmatprep.mubr.bf16.mxu0 %v1144_v13  ;;  %v646_v42 = vadd.f32 %v645_v37, %v3590_v3  ;;  %v647_v43 = vpop.f32.mrb[18].mxu1  ;;  %v3689_v44 = vpack.c.bf16 %v1096_v33, %v1092_v22 }
 0x10d   : > { %v911_v18 = vmul.f32 0.2, %v568_v19  ;;  %1654 = vmatmul.mubr.bf16.gmra.mrb[44].mxu0 %v1143_v5  ;;  %v1035_v40 = vmax.f32 %v564_v1, %v907_v17  ;;  %v971_v49 = vmul.f32 0.2, %v644_v36  ;;  %v648_v50 = vadd.f32 %v647_v43, %v3585_v31  ;;  %v649_v52 = vpop.f32.mrb[19].mxu1 }
 0x10e   : > { %v912_v35 = vmul.f32 0.2, %v570_v24  ;;  %1797 = vmatpush1.bf16.msra.mxu0 %v3182_v8  ;;  %v1036_v46 = vmax.f32 %v566_v11, %v908_v21  ;;  %v972_v56 = vmul.f32 0.2, %v646_v42  ;;  %v650_v58 = vadd.f32 %v649_v52, %v3590_v3  ;;  %v3193_v1 = vld [vmem:[%s4151_s3 + $0x194] ss:$8 sps:$4 sm:$0xff]  }
 0x10f   : > { %v1039_v41 = vmax.f32 %v568_v19, %v911_v18  ;;  %1798 = vmatprep.subr.bf16.mxu0 %v3187_v16  ;;  %v1099_v63 = vmax.f32 %v644_v36, %v971_v49  ;;  %v975_v0 = vmul.f32 0.2, %v648_v50 }
 0x110   : > { %v1040_v47 = vmax.f32 %v570_v24, %v912_v35  ;;  %v573_v48 = vpop.f32.mrb[20].mxu0  ;;  %v1100_v7 = vmax.f32 %v646_v42, %v972_v56  ;;  %v976_v8 = vmul.f32 0.2, %v650_v58 }
 0x111   : > { %v574_v53 = vadd.f32 %v573_v48, %v3585_v31  ;;  %v575_v54 = vpop.f32.mrb[21].mxu0  ;;  %v1147_v55 = vpack.c.bf16 %v1039_v41, %v1035_v40  ;;  %v1103_v13 = vmax.f32 %v648_v50, %v975_v0  ;;  %v3194_v48 = vld [vmem:[%s4151_s3 + $0x1a0] ss:$8 sps:$4 sm:$0xff]  }
 0x112   : > { %v576_v60 = vadd.f32 %v575_v54, %v3590_v3  ;;  %v577_v61 = vpop.f32.mrb[22].mxu0  ;;  %v1148_v62 = vpack.c.bf16 %v1040_v47, %v1036_v46  ;;  %1799 = vmatpush1.bf16.msra.mxu0 %v3185_v39  ;;  %v1104_v15 = vmax.f32 %v650_v58, %v976_v8  ;;  %v653_v16 = vpop.f32.mrb[20].mxu1 }
 0x113   : > { %v915_v4 = vmul.f32 0.2, %v574_v53  ;;  %v578_v5 = vadd.f32 %v577_v61, %v3585_v31  ;;  %v579_v6 = vpop.f32.mrb[23].mxu0  ;;  %1800 = vmatprep.subr.bf16.mxu0 %v3190_v45  ;;  %v654_v19 = vadd.f32 %v653_v16, %v3585_v31  ;;  %v655_v20 = vpop.f32.mrb[21].mxu1  ;;  %v3707_v22 = vpack.c.bf16 %v1103_v13, %v1099_v63 }
 0x114   : > { %v916_v11 = vmul.f32 0.2, %v576_v60  ;;  %v580_v12 = vadd.f32 %v579_v6, %v3590_v3  ;;  %1663 = vmatprep.mubr.bf16.mxu0 %v1148_v62  ;;  %v656_v25 = vadd.f32 %v655_v20, %v3590_v3  ;;  %v657_v18 = vpop.f32.mrb[22].mxu1  ;;  %v3713_v33 = vpack.c.bf16 %v1104_v15, %v1100_v7 }
 0x115   : > { %v919_v14 = vmul.f32 0.2, %v578_v5  ;;  %1664 = vmatmul.mubr.bf16.gmra.mrb[48].mxu0 %v1147_v55  ;;  %v1043_v21 = vmax.f32 %v574_v53, %v915_v4  ;;  %v979_v39 = vmul.f32 0.2, %v654_v19  ;;  %v658_v40 = vadd.f32 %v657_v18, %v3585_v31  ;;  %v659_v41 = vpop.f32.mrb[23].mxu1 }
 0x116   : > { %v920_v17 = vmul.f32 0.2, %v580_v12  ;;  %1801 = vmatpush1.bf16.msra.mxu0 %v3188_v59  ;;  %v1044_v35 = vmax.f32 %v576_v60, %v916_v11  ;;  %v980_v46 = vmul.f32 0.2, %v656_v25  ;;  %v660_v47 = vadd.f32 %v659_v41, %v3590_v3  ;;  %v3199_v55 = vld [vmem:[%s4151_s3 + $0x1b4] ss:$8 sps:$4 sm:$0xff]  }
 0x117   : > { %v1047_v24 = vmax.f32 %v578_v5, %v919_v14  ;;  %1802 = vmatprep.subr.bf16.mxu0 %v3193_v1  ;;  %v1107_v53 = vmax.f32 %v654_v19, %v979_v39  ;;  %v983_v54 = vmul.f32 0.2, %v658_v40  ;;  %v3202_v19 = vld [vmem:[%s4151_s3 + $0x1c4] ss:$8 sps:$4 sm:$0xff]  }
 0x118   : > { %v1048_v36 = vmax.f32 %v580_v12, %v920_v17  ;;  %v583_v37 = vpop.f32.mrb[24].mxu0  ;;  %v1108_v60 = vmax.f32 %v656_v25, %v980_v46  ;;  %v984_v61 = vmul.f32 0.2, %v660_v47  ;;  %v3197_v12 = vld [vmem:[%s4151_s3 + $0x1b0] ss:$8 sps:$4 sm:$0xff]  }
 0x119   : > { %v584_v42 = vadd.f32 %v583_v37, %v3585_v31  ;;  %v585_v43 = vpop.f32.mrb[25].mxu0  ;;  %v1151_v45 = vpack.c.bf16 %v1047_v24, %v1043_v21  ;;  %v1111_v0 = vmax.f32 %v658_v40, %v983_v54  ;;  %v3200_v40 = vld [vmem:[%s4151_s3 + $0x1c0] ss:$8 sps:$4 sm:$0xff]  }
 0x11a   : > { %v586_v49 = vadd.f32 %v585_v43, %v3590_v3  ;;  %v587_v50 = vpop.f32.mrb[26].mxu0  ;;  %v1152_v52 = vpack.c.bf16 %v1048_v36, %v1044_v35  ;;  %1803 = vmatpush1.bf16.msra.mxu0 %v3191_v10  ;;  %v1112_v4 = vmax.f32 %v660_v47, %v984_v61  ;;  %v663_v5 = vpop.f32.mrb[24].mxu1  ;;  %v3205_v47 = vld [vmem:[%s4151_s3 + $0x1d4] ss:$8 sps:$4 sm:$0xff]   ;;  %v401_v61 = vsub.s32 2, %v3572_v27 }
 0x11b   : > { %v923_v56 = vmul.f32 0.2, %v584_v42  ;;  %v588_v58 = vadd.f32 %v587_v50, %v3585_v31  ;;  %v589_v59 = vpop.f32.mrb[27].mxu0  ;;  %1804 = vmatprep.subr.bf16.mxu0 %v3196_v34  ;;  %v664_v7 = vadd.f32 %v663_v5, %v3585_v31  ;;  %v665_v8 = vpop.f32.mrb[25].mxu1  ;;  %v3731_v11 = vpack.c.bf16 %v1111_v0, %v1107_v53  ;;  %v3203_v5 = vld [vmem:[%s4151_s3 + $0x1d0] ss:$8 sps:$4 sm:$0xff]  }
 0x11c   : > { %v924_v62 = vmul.f32 0.2, %v586_v49  ;;  %v590_v63 = vadd.f32 %v589_v59, %v3590_v3  ;;  %1673 = vmatprep.mubr.bf16.mxu0 %v1152_v52  ;;  %v666_v15 = vadd.f32 %v665_v8, %v3590_v3  ;;  %v667_v16 = vpop.f32.mrb[26].mxu1  ;;  %v3737_v17 = vpack.c.bf16 %v1112_v4, %v1108_v60 }
 0x11d   : > { %v927_v1 = vmul.f32 0.2, %v588_v58  ;;  %1674 = vmatmul.mubr.bf16.gmra.mrb[52].mxu0 %v1151_v45  ;;  %v1051_v13 = vmax.f32 %v584_v42, %v923_v56  ;;  %v987_v24 = vmul.f32 0.2, %v664_v7  ;;  %v668_v25 = vadd.f32 %v667_v16, %v3585_v31  ;;  %v669_v18 = vpop.f32.mrb[27].mxu1 }
 0x11e   : > { %v928_v6 = vmul.f32 0.2, %v590_v63  ;;  %1805 = vmatpush1.bf16.msra.mxu0 %v3194_v48  ;;  %v1052_v20 = vmax.f32 %v586_v49, %v924_v62  ;;  %v988_v37 = vmul.f32 0.2, %v666_v15  ;;  %v670_v39 = vadd.f32 %v669_v18, %v3590_v3 }
 0x11f   : > { %v1055_v14 = vmax.f32 %v588_v58, %v927_v1  ;;  %1806 = vmatprep.subr.bf16.mxu0 %v3199_v55  ;;  %v1115_v45 = vmax.f32 %v664_v7, %v987_v24  ;;  %v991_v46 = vmul.f32 0.2, %v668_v25  ;;  %v405_v1 = vsub.s32 3, %v3572_v27 }
 0x120   : > { %v1056_v10 = vmax.f32 %v590_v63, %v928_v6  ;;  %v593_v21 = vpop.f32.mrb[28].mxu0  ;;  %v1116_v52 = vmax.f32 %v666_v15, %v988_v37  ;;  %v992_v53 = vmul.f32 0.2, %v670_v39  ;;  %v3206_v37 = vld [vmem:[%s4151_s3 + $0x1e0] ss:$8 sps:$4 sm:$0xff]  }
 0x121   : > { %v594_v34 = vadd.f32 %v593_v21, %v3585_v31  ;;  %v595_v35 = vpop.f32.mrb[29].mxu0  ;;  %v1155_v36 = vpack.c.bf16 %v1055_v14, %v1051_v13  ;;  %v1119_v56 = vmax.f32 %v668_v25, %v991_v46  ;;  %v3208_v14 = vld [vmem:[%s4151_s3 + $0x1e4] ss:$8 sps:$4 sm:$0xff]  }
 0x122   : > { %v596_v41 = vadd.f32 %v595_v35, %v3590_v3  ;;  %v597_v42 = vpop.f32.mrb[30].mxu0  ;;  %v1156_v43 = vpack.c.bf16 %v1056_v10, %v1052_v20  ;;  %1807 = vmatpush1.bf16.msra.mxu0 %v3197_v12  ;;  %v1120_v59 = vmax.f32 %v670_v39, %v992_v53  ;;  %v673_v60 = vpop.f32.mrb[28].mxu1 }
 0x123   : > { %v931_v48 = vmul.f32 0.2, %v594_v34  ;;  %v598_v49 = vadd.f32 %v597_v42, %v3585_v31  ;;  %v599_v50 = vpop.f32.mrb[31].mxu0  ;;  %1808 = vmatprep.subr.bf16.mxu0 %v3202_v19  ;;  %v674_v63 = vadd.f32 %v673_v60, %v3585_v31  ;;  %v675_v0 = vpop.f32.mrb[29].mxu1  ;;  %v3757_v4 = vpack.c.bf16 %v1119_v56, %v1115_v45 }
 0x124   : > { %v932_v54 = vmul.f32 0.2, %v596_v41  ;;  %v600_v55 = vadd.f32 %v599_v50, %v3590_v3  ;;  %1683 = vmatprep.mubr.bf16.mxu0 %v1156_v43  ;;  %v676_v8 = vadd.f32 %v675_v0, %v3590_v3  ;;  %v677_v12 = vpop.f32.mrb[30].mxu1  ;;  %v3763_v13 = vpack.c.bf16 %v1120_v59, %v1116_v52 }
 0x125   : > { %v935_v58 = vmul.f32 0.2, %v598_v49  ;;  %1684 = vmatmul.mubr.bf16.gmra.mrb[56].mxu0 %v1155_v36  ;;  %v1059_v6 = vmax.f32 %v594_v34, %v931_v48  ;;  %v995_v19 = vmul.f32 0.2, %v674_v63  ;;  %v678_v20 = vadd.f32 %v677_v12, %v3585_v31  ;;  %v679_v10 = vpop.f32.mrb[31].mxu1 }
 0x126   : > { %v936_v62 = vmul.f32 0.2, %v600_v55  ;;  %1809 = vmatpush1.bf16.msra.mxu0 %v3200_v40  ;;  %v1060_v15 = vmax.f32 %v596_v41, %v932_v54  ;;  %v996_v24 = vmul.f32 0.2, %v676_v8  ;;  %v680_v25 = vadd.f32 %v679_v10, %v3590_v3  ;;  %v3211_v3 = vld [vmem:[%s4151_s3 + $0x1f4] ss:$8 sps:$4 sm:$0xff]  }
 0x127   : > { %v1063_v7 = vmax.f32 %v598_v49, %v935_v58  ;;  %1810 = vmatprep.subr.bf16.mxu0 %v3205_v47  ;;  %v1123_v34 = vmax.f32 %v674_v63, %v995_v19  ;;  %v999_v35 = vmul.f32 0.2, %v678_v20  ;;  %v3771_v36 = vrot.slane %v3580_v29, %v401_v61 }
 0x128   : > { %v1064_v16 = vmax.f32 %v600_v55, %v936_v62  ;;  %v1124_v39 = vmax.f32 %v676_v8, %v996_v24  ;;  %v1000_v40 = vmul.f32 0.2, %v680_v25  ;;  %v3777_v31 = vrot.slane %v3580_v29, %v405_v1  ;;  %v3209_v29 = vld [vmem:[%s4151_s3 + $0x1f0] ss:$8 sps:$4 sm:$0xff]  }
 0x129   : > { %v1159_v21 = vpack.c.bf16 %v1063_v7, %v1059_v6  ;;  %v1127_v41 = vmax.f32 %v678_v20, %v999_v35 }
 0x12a   : > { %v1160_v18 = vpack.c.bf16 %v1064_v16, %v1060_v15  ;;  %1811 = vmatpush1.bf16.msra.mxu0 %v3203_v5  ;;  %v1128_v42 = vmax.f32 %v680_v25, %v1000_v40  ;;  %v716_v43 = vpop.f32.mrb[32].mxu1 }
 0x12b   : > { %1812 = vmatprep.subr.bf16.mxu0 %v3208_v14  ;;  %v717_v45 = vadd.f32 %v716_v43, %v3771_v36  ;;  %v718_v46 = vpop.f32.mrb[33].mxu1  ;;  %v3784_v47 = vpack.c.bf16 %v1127_v41, %v1123_v34 }
 0x12c   : > { %1693 = vmatprep.mubr.bf16.mxu0 %v1160_v18  ;;  %v719_v48 = vadd.f32 %v718_v46, %v3777_v31  ;;  %v720_v49 = vpop.f32.mrb[34].mxu1  ;;  %v3790_v50 = vpack.c.bf16 %v1128_v42, %v1124_v39 }
 0x12d   : > { %1694 = vmatmul.mubr.bf16.gmra.mrb[60].mxu0 %v1159_v21  ;;  %v877_v52 = vmul.f32 0.2, %v717_v45  ;;  %v721_v53 = vadd.f32 %v720_v49, %v3771_v36 }
 0x12e   : > { %1703 = vmatprep.mubr.bf16.mxu0 %v3617_v32  ;;  %1813 = vmatpush1.bf16.msra.mxu0 %v3206_v37  ;;  %v722_v32 = vpop.f32.mrb[35].mxu1  ;;  %v878_v54 = vmul.f32 0.2, %v719_v48 }
 0x12f   : > { %1814 = vmatprep.subr.bf16.mxu0 %v3211_v3  ;;  %v723_v55 = vadd.f32 %v722_v32, %v3777_v31  ;;  %v1005_v56 = vmax.f32 %v717_v45, %v877_v52  ;;  %v881_v58 = vmul.f32 0.2, %v721_v53 }
 0x130   : > { %v1006_v59 = vmax.f32 %v719_v48, %v878_v54 }
 0x131   : > { %v882_v60 = vmul.f32 0.2, %v723_v55  ;;  %v1009_v61 = vmax.f32 %v721_v53, %v881_v58 }
 0x132   : > { %1815 = vmatpush1.bf16.msra.mxu0 %v3209_v29  ;;  %v726_v63 = vpop.f32.mrb[36].mxu1 }
 0x133   : > { %v1010_v62 = vmax.f32 %v723_v55, %v882_v60  ;;  %v3796_v0 = vpack.c.bf16 %v1009_v61, %v1005_v56  ;;  %v727_v1 = vadd.f32 %v726_v63, %v3771_v36  ;;  %v728_v5 = vpop.f32.mrb[37].mxu1 }
 0x134   : > { %v729_v6 = vadd.f32 %v728_v5, %v3777_v31  ;;  %v730_v7 = vpop.f32.mrb[38].mxu1 }
 0x135   : > { %1704 = vmatmul.mubr.bf16.gmra.mrb[64].mxu0 %v3611_v23  ;;  %v3800_v8 = vpack.c.bf16 %v1010_v62, %v1006_v59  ;;  %v885_v12 = vmul.f32 0.2, %v727_v1  ;;  %v731_v14 = vadd.f32 %v730_v7, %v3771_v36  ;;  %v732_v15 = vpop.f32.mrb[39].mxu1 }
 0x136   : > { %1713 = vmatprep.mubr.bf16.mxu0 %v3641_v9  ;;  %v886_v16 = vmul.f32 0.2, %v729_v6  ;;  %v733_v23 = vadd.f32 %v732_v15, %v3777_v31 }
 0x137   : > { %v1013_v19 = vmax.f32 %v727_v1, %v885_v12  ;;  %v889_v20 = vmul.f32 0.2, %v731_v14 }
 0x138   : > { %v1014_v9 = vmax.f32 %v729_v6, %v886_v16  ;;  %v890_v10 = vmul.f32 0.2, %v733_v23 }
 0x139   : > { %v1017_v21 = vmax.f32 %v731_v14, %v889_v20 }
 0x13a   : > { %v1018_v24 = vmax.f32 %v733_v23, %v890_v10  ;;  %v736_v25 = vpop.f32.mrb[40].mxu1 }
 0x13b   : > { %v737_v18 = vadd.f32 %v736_v25, %v3771_v36  ;;  %v738_v34 = vpop.f32.mrb[41].mxu1  ;;  %v3807_v35 = vpack.c.bf16 %v1017_v21, %v1013_v19 }
 0x13c   : > { %v739_v37 = vadd.f32 %v738_v34, %v3777_v31  ;;  %v740_v39 = vpop.f32.mrb[42].mxu1  ;;  %v3810_v40 = vpack.c.bf16 %v1018_v24, %v1014_v9 }
 0x13d   : > { %1714 = vmatmul.mubr.bf16.gmra.mrb[68].mxu0 %v3635_v2  ;;  %v893_v3 = vmul.f32 0.2, %v737_v18  ;;  %v741_v41 = vadd.f32 %v740_v39, %v3771_v36  ;;  %v742_v42 = vpop.f32.mrb[43].mxu1 }
 0x13e   : > { %1723 = vmatprep.mubr.bf16.mxu0 %v3665_v57  ;;  %v894_v43 = vmul.f32 0.2, %v739_v37  ;;  %v743_v2 = vadd.f32 %v742_v42, %v3777_v31 }
 0x13f   : > { %v1021_v45 = vmax.f32 %v737_v18, %v893_v3  ;;  %v897_v46 = vmul.f32 0.2, %v741_v41 }
 0x140   : > { %v1022_v57 = vmax.f32 %v739_v37, %v894_v43  ;;  %v898_v29 = vmul.f32 0.2, %v743_v2 }
 0x141   : > { %v1025_v48 = vmax.f32 %v741_v41, %v897_v46 }
 0x142   : > { %v1026_v49 = vmax.f32 %v743_v2, %v898_v29  ;;  %v746_v52 = vpop.f32.mrb[44].mxu1 }
 0x143   : > { %v747_v53 = vadd.f32 %v746_v52, %v3771_v36  ;;  %v748_v32 = vpop.f32.mrb[45].mxu1  ;;  %v3817_v54 = vpack.c.bf16 %v1025_v48, %v1021_v45 }
 0x144   : > { %v749_v55 = vadd.f32 %v748_v32, %v3777_v31  ;;  %v750_v56 = vpop.f32.mrb[46].mxu1  ;;  %v3820_v58 = vpack.c.bf16 %v1026_v49, %v1022_v57 }
 0x145   : > { %1724 = vmatmul.mubr.bf16.gmra.mrb[72].mxu0 %v3659_v51  ;;  %v901_v59 = vmul.f32 0.2, %v747_v53  ;;  %v751_v60 = vadd.f32 %v750_v56, %v3771_v36  ;;  %v752_v61 = vpop.f32.mrb[47].mxu1 }
 0x146   : > { %1733 = vmatprep.mubr.bf16.mxu0 %v3689_v44  ;;  %v902_v62 = vmul.f32 0.2, %v749_v55  ;;  %v753_v51 = vadd.f32 %v752_v61, %v3777_v31 }
 0x147   : > { %v1029_v63 = vmax.f32 %v747_v53, %v901_v59  ;;  %v905_v1 = vmul.f32 0.2, %v751_v60 }
 0x148   : > { %v1030_v44 = vmax.f32 %v749_v55, %v902_v62  ;;  %v906_v5 = vmul.f32 0.2, %v753_v51 }
 0x149   : > { %v1033_v6 = vmax.f32 %v751_v60, %v905_v1 }
 0x14a   : > { %v1034_v7 = vmax.f32 %v753_v51, %v906_v5  ;;  %v756_v12 = vpop.f32.mrb[48].mxu1 }
 0x14b   : > { %v757_v14 = vadd.f32 %v756_v12, %v3771_v36  ;;  %v758_v15 = vpop.f32.mrb[49].mxu1  ;;  %v3827_v16 = vpack.c.bf16 %v1033_v6, %v1029_v63 }
 0x14c   : > { %v759_v23 = vadd.f32 %v758_v15, %v3777_v31  ;;  %v760_v19 = vpop.f32.mrb[50].mxu1  ;;  %v3830_v20 = vpack.c.bf16 %v1034_v7, %v1030_v44 }
 0x14d   : > { %1734 = vmatmul.mubr.bf16.gmra.mrb[76].mxu0 %v3683_v38  ;;  %v909_v9 = vmul.f32 0.2, %v757_v14  ;;  %v761_v10 = vadd.f32 %v760_v19, %v3771_v36  ;;  %v762_v21 = vpop.f32.mrb[51].mxu1 }
 0x14e   : > { %1743 = vmatprep.mubr.bf16.mxu0 %v3713_v33  ;;  %v910_v24 = vmul.f32 0.2, %v759_v23  ;;  %v763_v38 = vadd.f32 %v762_v21, %v3777_v31 }
 0x14f   : > { %v1037_v25 = vmax.f32 %v757_v14, %v909_v9  ;;  %v913_v18 = vmul.f32 0.2, %v761_v10 }
 0x150   : > { %v1038_v33 = vmax.f32 %v759_v23, %v910_v24  ;;  %v914_v34 = vmul.f32 0.2, %v763_v38 }
 0x151   : > { %v1041_v37 = vmax.f32 %v761_v10, %v913_v18 }
 0x152   : > { %v1042_v39 = vmax.f32 %v763_v38, %v914_v34  ;;  %v766_v3 = vpop.f32.mrb[52].mxu1 }
 0x153   : > { %v767_v41 = vadd.f32 %v766_v3, %v3771_v36  ;;  %v768_v42 = vpop.f32.mrb[53].mxu1  ;;  %v3837_v43 = vpack.c.bf16 %v1041_v37, %v1037_v25 }
 0x154   : > { %v769_v2 = vadd.f32 %v768_v42, %v3777_v31  ;;  %v770_v45 = vpop.f32.mrb[54].mxu1  ;;  %v3840_v46 = vpack.c.bf16 %v1042_v39, %v1038_v33 }
 0x155   : > { %1744 = vmatmul.mubr.bf16.gmra.mrb[80].mxu0 %v3707_v22  ;;  %v917_v57 = vmul.f32 0.2, %v767_v41  ;;  %v771_v29 = vadd.f32 %v770_v45, %v3771_v36  ;;  %v772_v48 = vpop.f32.mrb[55].mxu1 }
 0x156   : > { %1753 = vmatprep.mubr.bf16.mxu0 %v3737_v17  ;;  %v918_v49 = vmul.f32 0.2, %v769_v2  ;;  %v773_v22 = vadd.f32 %v772_v48, %v3777_v31  ;;  %v3213_v48 = vld [vmem:[%s4153_s5] sm:$0xff]  }
 0x157   : > { %v1045_v52 = vmax.f32 %v767_v41, %v917_v57  ;;  %v921_v53 = vmul.f32 0.2, %v771_v29 }
 0x158   : > { %v1046_v17 = vmax.f32 %v769_v2, %v918_v49  ;;  %v922_v32 = vmul.f32 0.2, %v773_v22  ;;  %v3214_v49 = vld [vmem:[%s4153_s5 + $0x48] sm:$0xff]  }
 0x159   : > { %v1049_v55 = vmax.f32 %v771_v29, %v921_v53  ;;  %v3212_v29 = vld [vmem:[%s4153_s5 + $0x40] sm:$0xff]  }
 0x15a   : > { %v1050_v56 = vmax.f32 %v773_v22, %v922_v32  ;;  %v776_v59 = vpop.f32.mrb[56].mxu1  ;;  %2791 = vmatprep.subr.bf16.mxu1 %v3212_v29 }
 0x15b   : > { %v777_v60 = vadd.f32 %v776_v59, %v3771_v36  ;;  %v778_v61 = vpop.f32.mrb[57].mxu1  ;;  %v3847_v62 = vpack.c.bf16 %v1049_v55, %v1045_v52  ;;  %2792 = vmatpush3.bf16.msra.mxu1 %v3213_v48 }
 0x15c   : > { %v779_v51 = vadd.f32 %v778_v61, %v3777_v31  ;;  %v780_v63 = vpop.f32.mrb[58].mxu1  ;;  %v3850_v1 = vpack.c.bf16 %v1050_v56, %v1046_v17  ;;  %2793 = vmatprep.subr.bf16.mxu1 %v3214_v49 }
 0x15d   : > { %1754 = vmatmul.mubr.bf16.gmra.mrb[84].mxu0 %v3731_v11  ;;  %v925_v44 = vmul.f32 0.2, %v777_v60  ;;  %v781_v5 = vadd.f32 %v780_v63, %v3771_v36  ;;  %v782_v6 = vpop.f32.mrb[59].mxu1 }
 0x15e   : > { %1763 = vmatprep.mubr.bf16.mxu0 %v3763_v13  ;;  %v926_v7 = vmul.f32 0.2, %v779_v51  ;;  %v783_v11 = vadd.f32 %v782_v6, %v3777_v31 }
 0x15f   : > { %v1053_v12 = vmax.f32 %v777_v60, %v925_v44  ;;  %v929_v14 = vmul.f32 0.2, %v781_v5 }
 0x160   : > { %v1054_v13 = vmax.f32 %v779_v51, %v926_v7  ;;  %v930_v15 = vmul.f32 0.2, %v783_v11  ;;  %v3216_v51 = vld [vmem:[%s4153_s5 + $0x50] sm:$0xff]  }
 0x161   : > { %v1057_v23 = vmax.f32 %v781_v5, %v929_v14 }
 0x162   : > { %v1058_v19 = vmax.f32 %v783_v11, %v930_v15  ;;  %v786_v9 = vpop.f32.mrb[60].mxu1  ;;  %v3217_v11 = vld [vmem:[%s4153_s5 + $0x10] sm:$0xff]  }
 0x163   : > { %v787_v10 = vadd.f32 %v786_v9, %v3771_v36  ;;  %v788_v21 = vpop.f32.mrb[61].mxu1  ;;  %v3857_v24 = vpack.c.bf16 %v1057_v23, %v1053_v12 }
 0x164   : > { %v789_v38 = vadd.f32 %v788_v21, %v3777_v31  ;;  %v790_v25 = vpop.f32.mrb[62].mxu1  ;;  %v3860_v18 = vpack.c.bf16 %v1058_v19, %v1054_v13  ;;  %v3218_v13 = vld [vmem:[%s4153_s5 + $0x58] sm:$0xff]  }
 0x165   : > { %1764 = vmatmul.mubr.bf16.gmra.mrb[88].mxu0 %v3757_v4  ;;  %v933_v33 = vmul.f32 0.2, %v787_v10  ;;  %v791_v34 = vadd.f32 %v790_v25, %v3771_v36  ;;  %v792_v37 = vpop.f32.mrb[63].mxu1 }
 0x166   : > { %1773 = vmatprep.mubr.bf16.mxu0 %v3790_v50  ;;  %v934_v39 = vmul.f32 0.2, %v789_v38  ;;  %v793_v4 = vadd.f32 %v792_v37, %v3777_v31  ;;  %v3220_v37 = vld [vmem:[%s4153_s5 + $0x60] sm:$0xff]  }
 0x167   : > { %v1061_v3 = vmax.f32 %v787_v10, %v933_v33  ;;  %v937_v41 = vmul.f32 0.2, %v791_v34  ;;  %v3219_v33 = vld [vmem:[%s4153_s5 + $0x18] sm:$0xff]  }
 0x168   : > { %v1062_v50 = vmax.f32 %v789_v38, %v934_v39  ;;  %v938_v42 = vmul.f32 0.2, %v793_v4 }
 0x169   : > { %v1065_v2 = vmax.f32 %v791_v34, %v937_v41 }
 0x16a   : > { %v1066_v45 = vmax.f32 %v793_v4, %v938_v42  ;;  %v796_v57 = vpop.f32.mrb[64].mxu1  ;;  %v3221_v42 = vld [vmem:[%s4153_s5 + $0x20] sm:$0xff]  }
 0x16b   : > { %v797_v22 = vadd.f32 %v796_v57, %v3771_v36  ;;  %v798_v52 = vpop.f32.mrb[65].mxu1 }
 0x16c   : > { %v799_v53 = vadd.f32 %v798_v52, %v3777_v31  ;;  %v800_v17 = vpop.f32.mrb[66].mxu1  ;;  %v3879_v32 = vpack.c.bf16 %v1066_v45, %v1062_v50 }
 0x16d   : > { %1774 = vmatmul.mubr.bf16.gmra.mrb[92].mxu0 %v3784_v47  ;;  %v3876_v47 = vpack.c.bf16 %v1065_v2, %v1061_v3  ;;  %v941_v55 = vmul.f32 0.2, %v797_v22  ;;  %v801_v56 = vadd.f32 %v800_v17, %v3771_v36  ;;  %v802_v59 = vpop.f32.mrb[67].mxu1 }
 0x16e   : > { %1816 = vmatprep.mubr.bf16.mxu0 %v3800_v8  ;;  %v3215_v8 = vld [vmem:[%s4153_s5 + $0x8] sm:$0xff]   ;;  %v942_v60 = vmul.f32 0.2, %v799_v53  ;;  %v803_v61 = vadd.f32 %v802_v59, %v3777_v31 }
 0x16f   : > { %v1069_v63 = vmax.f32 %v797_v22, %v941_v55  ;;  %v945_v44 = vmul.f32 0.2, %v801_v56  ;;  %2794 = vmatpush3.bf16.msra.mxu1 %v3215_v8 }
 0x170   : > { %v1070_v5 = vmax.f32 %v799_v53, %v942_v60  ;;  %v946_v6 = vmul.f32 0.2, %v803_v61  ;;  %2795 = vmatprep.subr.bf16.mxu1 %v3216_v51 }
 0x171   : > { %v1073_v7 = vmax.f32 %v801_v56, %v945_v44 }
 0x172   : > { %v1074_v12 = vmax.f32 %v803_v61, %v946_v6  ;;  %v806_v14 = vpop.f32.mrb[68].mxu1 }
 0x173   : > { %v807_v15 = vadd.f32 %v806_v14, %v3771_v36  ;;  %v808_v23 = vpop.f32.mrb[69].mxu1  ;;  %v3898_v19 = vpack.c.bf16 %v1073_v7, %v1069_v63  ;;  %2796 = vmatpush3.bf16.msra.mxu1 %v3217_v11 }
 0x174   : > { %v3900_v9 = vpack.c.bf16 %v1074_v12, %v1070_v5  ;;  %v809_v10 = vadd.f32 %v808_v23, %v3777_v31  ;;  %v810_v21 = vpop.f32.mrb[70].mxu1  ;;  %2797 = vmatprep.subr.bf16.mxu1 %v3218_v13 }
 0x175   : > { %1817 = vmatmul.mubr.bf16.vlgmr.msra.gmra.mrb[32].mxu0 %v3796_v0  ;;  %v949_v0 = vmul.f32 0.2, %v807_v15  ;;  %v811_v38 = vadd.f32 %v810_v21, %v3771_v36  ;;  %v812_v25 = vpop.f32.mrb[71].mxu1 }
 0x176   : > { %1826 = vmatprep.mubr.bf16.mxu0 %v3810_v40  ;;  %v950_v40 = vmul.f32 0.2, %v809_v10  ;;  %v813_v34 = vadd.f32 %v812_v25, %v3777_v31 }
 0x177   : > { %v1077_v39 = vmax.f32 %v807_v15, %v949_v0  ;;  %v953_v4 = vmul.f32 0.2, %v811_v38  ;;  %2798 = vmatpush3.bf16.msra.mxu1 %v3219_v33 }
 0x178   : > { %v1078_v3 = vmax.f32 %v809_v10, %v950_v40  ;;  %v954_v41 = vmul.f32 0.2, %v813_v34  ;;  %2799 = vmatprep.subr.bf16.mxu1 %v3220_v37 }
 0x179   : > { %v1081_v50 = vmax.f32 %v811_v38, %v953_v4 }
 0x17a   : > { %v1082_v2 = vmax.f32 %v813_v34, %v954_v41  ;;  %v816_v45 = vpop.f32.mrb[72].mxu1 }
 0x17b   : > { %v817_v57 = vadd.f32 %v816_v45, %v3771_v36  ;;  %v818_v29 = vpop.f32.mrb[73].mxu1  ;;  %v3917_v48 = vpack.c.bf16 %v1081_v50, %v1077_v39  ;;  %2800 = vmatpush3.bf16.msra.mxu1 %v3221_v42 }
 0x17c   : > { %v819_v49 = vadd.f32 %v818_v29, %v3777_v31  ;;  %v820_v22 = vpop.f32.mrb[74].mxu1  ;;  %v3920_v52 = vpack.c.bf16 %v1082_v2, %v1078_v3 }
 0x17d   : > { %1827 = vmatmul.mubr.bf16.gmra.mrb[36].mxu0 %v3807_v35  ;;  %v957_v53 = vmul.f32 0.2, %v817_v57  ;;  %v821_v17 = vadd.f32 %v820_v22, %v3771_v36  ;;  %v822_v55 = vpop.f32.mrb[75].mxu1 }
 0x17e   : > { %1836 = vmatprep.mubr.bf16.mxu0 %v3820_v58  ;;  %v958_v35 = vmul.f32 0.2, %v819_v49  ;;  %v823_v56 = vadd.f32 %v822_v55, %v3777_v31 }
 0x17f   : > { %v1085_v59 = vmax.f32 %v817_v57, %v957_v53  ;;  %v961_v58 = vmul.f32 0.2, %v821_v17 }
 0x180   : > { %v1086_v8 = vmax.f32 %v819_v49, %v958_v35  ;;  %v962_v60 = vmul.f32 0.2, %v823_v56 }
 0x181   : > { %v1089_v61 = vmax.f32 %v821_v17, %v961_v58 }
 0x182   : > { %v1090_v51 = vmax.f32 %v823_v56, %v962_v60  ;;  %v826_v63 = vpop.f32.mrb[76].mxu1 }
 0x183   : > { %v827_v44 = vadd.f32 %v826_v63, %v3771_v36  ;;  %v828_v5 = vpop.f32.mrb[77].mxu1  ;;  %v3927_v6 = vpack.c.bf16 %v1089_v61, %v1085_v59 }
 0x184   : > { %v829_v7 = vadd.f32 %v828_v5, %v3777_v31  ;;  %v830_v11 = vpop.f32.mrb[78].mxu1  ;;  %v3930_v12 = vpack.c.bf16 %v1090_v51, %v1086_v8 }
 0x185   : > { %1837 = vmatmul.mubr.bf16.gmra.mrb[40].mxu0 %v3817_v54  ;;  %v965_v14 = vmul.f32 0.2, %v827_v44  ;;  %v831_v13 = vadd.f32 %v830_v11, %v3771_v36  ;;  %v832_v15 = vpop.f32.mrb[79].mxu1 }
 0x186   : > { %1846 = vmatprep.mubr.bf16.mxu0 %v3830_v20  ;;  %v966_v23 = vmul.f32 0.2, %v829_v7  ;;  %v833_v54 = vadd.f32 %v832_v15, %v3777_v31 }
 0x187   : > { %v1093_v10 = vmax.f32 %v827_v44, %v965_v14  ;;  %v969_v21 = vmul.f32 0.2, %v831_v13 }
 0x188   : > { %v1094_v20 = vmax.f32 %v829_v7, %v966_v23  ;;  %v970_v0 = vmul.f32 0.2, %v833_v54 }
 0x189   : > { %v1097_v38 = vmax.f32 %v831_v13, %v969_v21 }
 0x18a   : > { %v1098_v25 = vmax.f32 %v833_v54, %v970_v0  ;;  %v836_v33 = vpop.f32.mrb[80].mxu1 }
 0x18b   : > { %v837_v40 = vadd.f32 %v836_v33, %v3771_v36  ;;  %v838_v34 = vpop.f32.mrb[81].mxu1  ;;  %v3937_v37 = vpack.c.bf16 %v1097_v38, %v1093_v10 }
 0x18c   : > { %v839_v39 = vadd.f32 %v838_v34, %v3777_v31  ;;  %v840_v4 = vpop.f32.mrb[82].mxu1  ;;  %v3940_v3 = vpack.c.bf16 %v1098_v25, %v1094_v20 }
 0x18d   : > { %1847 = vmatmul.mubr.bf16.gmra.mrb[44].mxu0 %v3827_v16  ;;  %v973_v41 = vmul.f32 0.2, %v837_v40  ;;  %v841_v50 = vadd.f32 %v840_v4, %v3771_v36  ;;  %v842_v42 = vpop.f32.mrb[83].mxu1 }
 0x18e   : > { %1856 = vmatprep.mubr.bf16.mxu0 %v3840_v46  ;;  %v974_v2 = vmul.f32 0.2, %v839_v39  ;;  %v843_v16 = vadd.f32 %v842_v42, %v3777_v31 }
 0x18f   : > { %v1101_v45 = vmax.f32 %v837_v40, %v973_v41  ;;  %v977_v57 = vmul.f32 0.2, %v841_v50 }
 0x190   : > { %v1102_v46 = vmax.f32 %v839_v39, %v974_v2  ;;  %v978_v29 = vmul.f32 0.2, %v843_v16 }
 0x191   : > { %v1105_v49 = vmax.f32 %v841_v50, %v977_v57 }
 0x192   : > { %v1106_v22 = vmax.f32 %v843_v16, %v978_v29  ;;  %v846_v53 = vpop.f32.mrb[84].mxu1 }
 0x193   : > { %v847_v17 = vadd.f32 %v846_v53, %v3771_v36  ;;  %v848_v55 = vpop.f32.mrb[85].mxu1  ;;  %v3947_v35 = vpack.c.bf16 %v1105_v49, %v1101_v45 }
 0x194   : > { %v849_v56 = vadd.f32 %v848_v55, %v3777_v31  ;;  %v850_v59 = vpop.f32.mrb[86].mxu1  ;;  %v3950_v58 = vpack.c.bf16 %v1106_v22, %v1102_v46 }
 0x195   : > { %1857 = vmatmul.mubr.bf16.gmra.mrb[48].mxu0 %v3837_v43  ;;  %v981_v8 = vmul.f32 0.2, %v847_v17  ;;  %v851_v60 = vadd.f32 %v850_v59, %v3771_v36  ;;  %v852_v61 = vpop.f32.mrb[87].mxu1 }
 0x196   : > { %1866 = vmatprep.mubr.bf16.mxu0 %v3850_v1  ;;  %v982_v51 = vmul.f32 0.2, %v849_v56  ;;  %v853_v43 = vadd.f32 %v852_v61, %v3777_v31 }
 0x197   : > { %v1109_v63 = vmax.f32 %v847_v17, %v981_v8  ;;  %v985_v44 = vmul.f32 0.2, %v851_v60 }
 0x198   : > { %v1110_v1 = vmax.f32 %v849_v56, %v982_v51  ;;  %v986_v5 = vmul.f32 0.2, %v853_v43 }
 0x199   : > { %v1113_v7 = vmax.f32 %v851_v60, %v985_v44 }
 0x19a   : > { %v1114_v11 = vmax.f32 %v853_v43, %v986_v5  ;;  %v856_v14 = vpop.f32.mrb[88].mxu1 }
 0x19b   : > { %v857_v13 = vadd.f32 %v856_v14, %v3771_v36  ;;  %v858_v15 = vpop.f32.mrb[89].mxu1  ;;  %v1185_v23 = vpack.c.bf16 %v1113_v7, %v1109_v63 }
 0x19c   : > { %v859_v54 = vadd.f32 %v858_v15, %v3777_v31  ;;  %v860_v10 = vpop.f32.mrb[90].mxu1  ;;  %v1186_v21 = vpack.c.bf16 %v1114_v11, %v1110_v1 }
 0x19d   : > { %1867 = vmatmul.mubr.bf16.gmra.mrb[52].mxu0 %v3847_v62  ;;  %v989_v20 = vmul.f32 0.2, %v857_v13  ;;  %v861_v0 = vadd.f32 %v860_v10, %v3771_v36  ;;  %v862_v38 = vpop.f32.mrb[91].mxu1 }
 0x19e   : > { %1876 = vmatprep.mubr.bf16.mxu0 %v3860_v18  ;;  %v990_v25 = vmul.f32 0.2, %v859_v54  ;;  %v863_v33 = vadd.f32 %v862_v38, %v3777_v31 }
 0x19f   : > { %v1117_v62 = vmax.f32 %v857_v13, %v989_v20  ;;  %v993_v40 = vmul.f32 0.2, %v861_v0 }
 0x1a0   : > { %v1118_v34 = vmax.f32 %v859_v54, %v990_v25  ;;  %v994_v39 = vmul.f32 0.2, %v863_v33 }
 0x1a1   : > { %v1121_v18 = vmax.f32 %v861_v0, %v993_v40 }
 0x1a2   : > { %v1122_v4 = vmax.f32 %v863_v33, %v994_v39  ;;  %v866_v41 = vpop.f32.mrb[92].mxu1 }
 0x1a3   : > { %v867_v50 = vadd.f32 %v866_v41, %v3771_v36  ;;  %v868_v42 = vpop.f32.mrb[93].mxu1  ;;  %v1189_v2 = vpack.c.bf16 %v1121_v18, %v1117_v62 }
 0x1a4   : > { %v869_v16 = vadd.f32 %v868_v42, %v3777_v31  ;;  %v870_v45 = vpop.f32.mrb[94].mxu1  ;;  %v1190_v57 = vpack.c.bf16 %v1122_v4, %v1118_v34 }
 0x1a5   : > { %1877 = vmatmul.mubr.bf16.gmra.mrb[56].mxu0 %v3857_v24  ;;  %v997_v46 = vmul.f32 0.2, %v867_v50  ;;  %v871_v29 = vadd.f32 %v870_v45, %v3771_v36  ;;  %v872_v49 = vpop.f32.mrb[95].mxu1  ;;  %v3222_v36 = vld [vmem:[%s4153_s5 + $0x68] sm:$0xff]  }
 0x1a6   : > { %1886 = vmatprep.mubr.bf16.mxu0 %v3879_v32  ;;  %v998_v22 = vmul.f32 0.2, %v869_v16  ;;  %v873_v53 = vadd.f32 %v872_v49, %v3777_v31  ;;  %v3223_v31 = vld [vmem:[%s4153_s5 + $0x28] sm:$0xff]   ;;  %2801 = vmatprep.subr.bf16.mxu1 %v3222_v36 }
 0x1a7   : > { %v1125_v24 = vmax.f32 %v867_v50, %v997_v46  ;;  %v1001_v17 = vmul.f32 0.2, %v871_v29  ;;  %2802 = vmatpush3.bf16.msra.mxu1 %v3223_v31 }
 0x1a8   : > { %v1126_v55 = vmax.f32 %v869_v16, %v998_v22  ;;  %v1002_v56 = vmul.f32 0.2, %v873_v53 }
 0x1a9   : > { %v1129_v32 = vmax.f32 %v871_v29, %v1001_v17 }
 0x1aa   : > { %v1130_v59 = vmax.f32 %v873_v53, %v1002_v56 }
 0x1ab   : > { %v1193_v8 = vpack.c.bf16 %v1129_v32, %v1125_v24 }
 0x1ac   : > { %v1194_v60 = vpack.c.bf16 %v1130_v59, %v1126_v55 }
 0x1ad   : > { %1887 = vmatmul.mubr.bf16.gmra.mrb[60].mxu0 %v3876_v47  ;;  %v3224_v47 = vld [vmem:[%s4153_s5 + $0x70] sm:$0xff]  }
 0x1ae   : > { %1896 = vmatprep.mubr.bf16.mxu0 %v3900_v9  ;;  %2803 = vmatprep.subr.bf16.mxu1 %v3224_v47  ;;  %v3226_v9 = vld [vmem:[%s4153_s5 + $0x78] sm:$0xff]  }
 0x1b5   : > { %1897 = vmatmul.mubr.bf16.gmra.mrb[64].mxu0 %v3898_v19  ;;  %v3225_v19 = vld [vmem:[%s4153_s5 + $0x30] sm:$0xff]  }
 0x1b6   : > { %1906 = vmatprep.mubr.bf16.mxu0 %v3920_v52  ;;  %2804 = vmatpush3.bf16.msra.mxu1 %v3225_v19  ;;  %v1259_v52 = vld [vmem:[%s4152_s4] sm:$0x3] }
 0x1b7   : > { %2805 = vmatprep.subr.bf16.mxu1 %v3226_v9 }
 0x1bd   : > { %1907 = vmatmul.mubr.bf16.gmra.mrb[68].mxu0 %v3917_v48  ;;  %v3227_v48 = vld [vmem:[%s4153_s5 + $0x38] sm:$0xff]  }
 0x1be   : > { %1916 = vmatprep.mubr.bf16.mxu0 %v3930_v12  ;;  %2806 = vmatpush3.bf16.msra.mxu1 %v3227_v48  ;;  %v4003_v12 = vrot.slane %v1259_v52, %v397_v30 }
 0x1c5   : > { %1917 = vmatmul.mubr.bf16.gmra.mrb[72].mxu0 %v3927_v6  ;;  %v3999_v6 = vrot.slane %v1259_v52, %v3575_v28 }
 0x1c6   : > { %1926 = vmatprep.mubr.bf16.mxu0 %v3940_v3 }
 0x1cd   : > { %1927 = vmatmul.mubr.bf16.gmra.mrb[76].mxu0 %v3937_v37 }
 0x1ce   : > { %1936 = vmatprep.mubr.bf16.mxu0 %v3950_v58 }
 0x1d5   : > { %1937 = vmatmul.mubr.bf16.gmra.mrb[80].mxu0 %v3947_v35 }
 0x1d6   : > { %1946 = vmatprep.mubr.bf16.mxu0 %v1186_v21 }
 0x1dd   : > { %1947 = vmatmul.mubr.bf16.gmra.mrb[84].mxu0 %v1185_v23 }
 0x1de   : > { %1956 = vmatprep.mubr.bf16.mxu0 %v1190_v57 }
 0x1e5   : > { %1957 = vmatmul.mubr.bf16.gmra.mrb[88].mxu0 %v1189_v2 }
 0x1e6   : > { %1966 = vmatprep.mubr.bf16.mxu0 %v1194_v60 }
 0x1ed   : > { %1967 = vmatmul.mubr.bf16.gmra.mrb[92].mxu0 %v1193_v8 }
 0x248   : > { %v1818_v37 = vpop.f32.mrb[32].mxu0 }
 0x249   : > { %v2971_v3 = vadd.f32 %v1818_v37, %v3999_v6  ;;  %v1820_v35 = vpop.f32.mrb[33].mxu0 }
 0x24a   : > { %v2972_v58 = vadd.f32 %v1820_v35, %v4003_v12  ;;  %v1822_v61 = vpop.f32.mrb[34].mxu0 }
 0x24b   : > { %v1977_v51 = vmul.f32 0.2, %v2971_v3  ;;  %v2973_v43 = vadd.f32 %v1822_v61, %v3999_v6  ;;  %v1824_v63 = vpop.f32.mrb[35].mxu0 }
 0x24c   : > { %v1978_v44 = vmul.f32 0.2, %v2972_v58  ;;  %v2974_v1 = vadd.f32 %v1824_v63, %v4003_v12 }
 0x24d   : > { %v1979_v5 = vmul.f32 0.2, %v2973_v43  ;;  %v2041_v11 = vmax.f32 %v2971_v3, %v1977_v51 }
 0x24e   : > { %v1980_v7 = vmul.f32 0.2, %v2974_v1  ;;  %v2042_v30 = vmax.f32 %v2972_v58, %v1978_v44 }
 0x24f   : > { %v2043_v14 = vmax.f32 %v2973_v43, %v1979_v5 }
 0x250   : > { %v2044_v13 = vmax.f32 %v2974_v1, %v1980_v7  ;;  %v1828_v15 = vpop.f32.mrb[36].mxu0 }
 0x251   : > { %v2105_v23 = vpack.c.bf16 %v2043_v14, %v2041_v11  ;;  %v2975_v54 = vadd.f32 %v1828_v15, %v3999_v6  ;;  %v1830_v10 = vpop.f32.mrb[37].mxu0 }
 0x252   : > { %v2976_v21 = vadd.f32 %v1830_v10, %v4003_v12  ;;  %v1832_v20 = vpop.f32.mrb[38].mxu0  ;;  %v2106_v0 = vpack.c.bf16 %v2044_v13, %v2042_v30 }
 0x253   : > { %v1981_v38 = vmul.f32 0.2, %v2975_v54  ;;  %v2977_v25 = vadd.f32 %v1832_v20, %v3999_v6  ;;  %v1834_v33 = vpop.f32.mrb[39].mxu0 }
 0x254   : > { %v1982_v62 = vmul.f32 0.2, %v2976_v21  ;;  %v2978_v40 = vadd.f32 %v1834_v33, %v4003_v12  ;;  %2304 = vmatprep.mubr.bf16.mxu1 %v2106_v0 }
 0x255   : > { %v1983_v34 = vmul.f32 0.2, %v2977_v25  ;;  %2305 = vmatmul.mubr.bf16.vlgmr.msra.gmra.mrb[96].mxu1 %v2105_v23  ;;  %v2045_v18 = vmax.f32 %v2975_v54, %v1981_v38 }
 0x256   : > { %v1984_v39 = vmul.f32 0.2, %v2978_v40  ;;  %v2046_v41 = vmax.f32 %v2976_v21, %v1982_v62 }
 0x257   : > { %v2047_v4 = vmax.f32 %v2977_v25, %v1983_v34 }
 0x258   : > { %v2048_v50 = vmax.f32 %v2978_v40, %v1984_v39  ;;  %v1838_v42 = vpop.f32.mrb[40].mxu0 }
 0x259   : > { %v2979_v2 = vadd.f32 %v1838_v42, %v3999_v6  ;;  %v1840_v16 = vpop.f32.mrb[41].mxu0  ;;  %v2107_v45 = vpack.c.bf16 %v2047_v4, %v2045_v18 }
 0x25a   : > { %v2980_v57 = vadd.f32 %v1840_v16, %v4003_v12  ;;  %v1842_v46 = vpop.f32.mrb[42].mxu0  ;;  %v2108_v29 = vpack.c.bf16 %v2048_v50, %v2046_v41 }
 0x25b   : > { %v1985_v49 = vmul.f32 0.2, %v2979_v2  ;;  %v2981_v22 = vadd.f32 %v1842_v46, %v3999_v6  ;;  %v1844_v53 = vpop.f32.mrb[43].mxu0 }
 0x25c   : > { %v1986_v24 = vmul.f32 0.2, %v2980_v57  ;;  %v2982_v17 = vadd.f32 %v1844_v53, %v4003_v12  ;;  %2312 = vmatprep.mubr.bf16.mxu1 %v2108_v29 }
 0x25d   : > { %v1987_v55 = vmul.f32 0.2, %v2981_v22  ;;  %2313 = vmatmul.mubr.bf16.gmra.mrb[100].mxu1 %v2107_v45  ;;  %v2049_v32 = vmax.f32 %v2979_v2, %v1985_v49 }
 0x25e   : > { %v1988_v56 = vmul.f32 0.2, %v2982_v17  ;;  %v2050_v8 = vmax.f32 %v2980_v57, %v1986_v24 }
 0x25f   : > { %v2051_v59 = vmax.f32 %v2981_v22, %v1987_v55 }
 0x260   : > { %v2052_v60 = vmax.f32 %v2982_v17, %v1988_v56  ;;  %v1848_v36 = vpop.f32.mrb[44].mxu0 }
 0x261   : > { %v2983_v31 = vadd.f32 %v1848_v36, %v3999_v6  ;;  %v1850_v47 = vpop.f32.mrb[45].mxu0  ;;  %v2109_v19 = vpack.c.bf16 %v2051_v59, %v2049_v32 }
 0x262   : > { %v2984_v9 = vadd.f32 %v1850_v47, %v4003_v12  ;;  %v1852_v48 = vpop.f32.mrb[46].mxu0  ;;  %v2110_v52 = vpack.c.bf16 %v2052_v60, %v2050_v8 }
 0x263   : > { %v1989_v37 = vmul.f32 0.2, %v2983_v31  ;;  %v2985_v3 = vadd.f32 %v1852_v48, %v3999_v6  ;;  %v1854_v35 = vpop.f32.mrb[47].mxu0 }
 0x264   : > { %v1990_v58 = vmul.f32 0.2, %v2984_v9  ;;  %v2986_v61 = vadd.f32 %v1854_v35, %v4003_v12  ;;  %2320 = vmatprep.mubr.bf16.mxu1 %v2110_v52 }
 0x265   : > { %v1991_v51 = vmul.f32 0.2, %v2985_v3  ;;  %2321 = vmatmul.mubr.bf16.gmra.mrb[104].mxu1 %v2109_v19  ;;  %v2053_v63 = vmax.f32 %v2983_v31, %v1989_v37 }
 0x266   : > { %v1992_v43 = vmul.f32 0.2, %v2986_v61  ;;  %v2054_v1 = vmax.f32 %v2984_v9, %v1990_v58 }
 0x267   : > { %v2055_v44 = vmax.f32 %v2985_v3, %v1991_v51 }
 0x268   : > { %v2056_v5 = vmax.f32 %v2986_v61, %v1992_v43  ;;  %v1858_v7 = vpop.f32.mrb[48].mxu0 }
 0x269   : > { %v2987_v11 = vadd.f32 %v1858_v7, %v3999_v6  ;;  %v1860_v14 = vpop.f32.mrb[49].mxu0  ;;  %v2111_v30 = vpack.c.bf16 %v2055_v44, %v2053_v63 }
 0x26a   : > { %v2988_v13 = vadd.f32 %v1860_v14, %v4003_v12  ;;  %v1862_v15 = vpop.f32.mrb[50].mxu0  ;;  %v2112_v23 = vpack.c.bf16 %v2056_v5, %v2054_v1 }
 0x26b   : > { %v1993_v54 = vmul.f32 0.2, %v2987_v11  ;;  %v2989_v10 = vadd.f32 %v1862_v15, %v3999_v6  ;;  %v1864_v21 = vpop.f32.mrb[51].mxu0 }
 0x26c   : > { %v1994_v20 = vmul.f32 0.2, %v2988_v13  ;;  %v2990_v0 = vadd.f32 %v1864_v21, %v4003_v12  ;;  %2328 = vmatprep.mubr.bf16.mxu1 %v2112_v23 }
 0x26d   : > { %v1995_v38 = vmul.f32 0.2, %v2989_v10  ;;  %2329 = vmatmul.mubr.bf16.gmra.mrb[108].mxu1 %v2111_v30  ;;  %v2057_v33 = vmax.f32 %v2987_v11, %v1993_v54 }
 0x26e   : > { %v1996_v25 = vmul.f32 0.2, %v2990_v0  ;;  %v2058_v40 = vmax.f32 %v2988_v13, %v1994_v20 }
 0x26f   : > { %v2059_v62 = vmax.f32 %v2989_v10, %v1995_v38 }
 0x270   : > { %v2060_v34 = vmax.f32 %v2990_v0, %v1996_v25  ;;  %v1868_v39 = vpop.f32.mrb[52].mxu0 }
 0x271   : > { %v2991_v18 = vadd.f32 %v1868_v39, %v3999_v6  ;;  %v1870_v4 = vpop.f32.mrb[53].mxu0  ;;  %v2113_v41 = vpack.c.bf16 %v2059_v62, %v2057_v33 }
 0x272   : > { %v2992_v50 = vadd.f32 %v1870_v4, %v4003_v12  ;;  %v1872_v42 = vpop.f32.mrb[54].mxu0  ;;  %v2114_v2 = vpack.c.bf16 %v2060_v34, %v2058_v40 }
 0x273   : > { %v1997_v16 = vmul.f32 0.2, %v2991_v18  ;;  %v2993_v45 = vadd.f32 %v1872_v42, %v3999_v6  ;;  %v1874_v57 = vpop.f32.mrb[55].mxu0 }
 0x274   : > { %v1998_v46 = vmul.f32 0.2, %v2992_v50  ;;  %v2994_v29 = vadd.f32 %v1874_v57, %v4003_v12  ;;  %2336 = vmatprep.mubr.bf16.mxu1 %v2114_v2 }
 0x275   : > { %v1999_v49 = vmul.f32 0.2, %v2993_v45  ;;  %2337 = vmatmul.mubr.bf16.gmra.mrb[112].mxu1 %v2113_v41  ;;  %v2061_v53 = vmax.f32 %v2991_v18, %v1997_v16 }
 0x276   : > { %v2000_v22 = vmul.f32 0.2, %v2994_v29  ;;  %v2062_v17 = vmax.f32 %v2992_v50, %v1998_v46 }
 0x277   : > { %v2063_v24 = vmax.f32 %v2993_v45, %v1999_v49 }
 0x278   : > { %v2064_v55 = vmax.f32 %v2994_v29, %v2000_v22  ;;  %v1878_v56 = vpop.f32.mrb[56].mxu0 }
 0x279   : > { %v2995_v32 = vadd.f32 %v1878_v56, %v3999_v6  ;;  %v1880_v59 = vpop.f32.mrb[57].mxu0  ;;  %v2115_v8 = vpack.c.bf16 %v2063_v24, %v2061_v53 }
 0x27a   : > { %v2996_v60 = vadd.f32 %v1880_v59, %v4003_v12  ;;  %v1882_v36 = vpop.f32.mrb[58].mxu0  ;;  %v2116_v31 = vpack.c.bf16 %v2064_v55, %v2062_v17 }
 0x27b   : > { %v2001_v47 = vmul.f32 0.2, %v2995_v32  ;;  %v2997_v19 = vadd.f32 %v1882_v36, %v3999_v6  ;;  %v1884_v9 = vpop.f32.mrb[59].mxu0 }
 0x27c   : > { %v2002_v48 = vmul.f32 0.2, %v2996_v60  ;;  %v2998_v52 = vadd.f32 %v1884_v9, %v4003_v12  ;;  %2344 = vmatprep.mubr.bf16.mxu1 %v2116_v31 }
 0x27d   : > { %v2003_v37 = vmul.f32 0.2, %v2997_v19  ;;  %2345 = vmatmul.mubr.bf16.gmra.mrb[116].mxu1 %v2115_v8  ;;  %v2065_v35 = vmax.f32 %v2995_v32, %v2001_v47 }
 0x27e   : > { %v2004_v3 = vmul.f32 0.2, %v2998_v52  ;;  %v2066_v61 = vmax.f32 %v2996_v60, %v2002_v48 }
 0x27f   : > { %v2067_v58 = vmax.f32 %v2997_v19, %v2003_v37 }
 0x280   : > { %v2068_v51 = vmax.f32 %v2998_v52, %v2004_v3  ;;  %v1888_v43 = vpop.f32.mrb[60].mxu0 }
 0x281   : > { %v2999_v63 = vadd.f32 %v1888_v43, %v3999_v6  ;;  %v1890_v44 = vpop.f32.mrb[61].mxu0  ;;  %v2117_v1 = vpack.c.bf16 %v2067_v58, %v2065_v35 }
 0x282   : > { %v3000_v5 = vadd.f32 %v1890_v44, %v4003_v12  ;;  %v1892_v7 = vpop.f32.mrb[62].mxu0  ;;  %v2118_v11 = vpack.c.bf16 %v2068_v51, %v2066_v61 }
 0x283   : > { %v2005_v14 = vmul.f32 0.2, %v2999_v63  ;;  %v3001_v30 = vadd.f32 %v1892_v7, %v3999_v6  ;;  %v1894_v13 = vpop.f32.mrb[63].mxu0 }
 0x284   : > { %v2006_v15 = vmul.f32 0.2, %v3000_v5  ;;  %v3002_v23 = vadd.f32 %v1894_v13, %v4003_v12  ;;  %2352 = vmatprep.mubr.bf16.mxu1 %v2118_v11 }
 0x285   : > { %v2007_v54 = vmul.f32 0.2, %v3001_v30  ;;  %2353 = vmatmul.mubr.bf16.gmra.mrb[120].mxu1 %v2117_v1  ;;  %v2069_v21 = vmax.f32 %v2999_v63, %v2005_v14 }
 0x286   : > { %v2008_v10 = vmul.f32 0.2, %v3002_v23  ;;  %v2070_v0 = vmax.f32 %v3000_v5, %v2006_v15 }
 0x287   : > { %v2071_v20 = vmax.f32 %v3001_v30, %v2007_v54 }
 0x288   : > { %v2072_v38 = vmax.f32 %v3002_v23, %v2008_v10  ;;  %v1898_v25 = vpop.f32.mrb[64].mxu0 }
 0x289   : > { %v3003_v33 = vadd.f32 %v1898_v25, %v3999_v6  ;;  %v1900_v62 = vpop.f32.mrb[65].mxu0  ;;  %v2119_v40 = vpack.c.bf16 %v2071_v20, %v2069_v21 }
 0x28a   : > { %v3004_v34 = vadd.f32 %v1900_v62, %v4003_v12  ;;  %v1902_v39 = vpop.f32.mrb[66].mxu0  ;;  %v2120_v18 = vpack.c.bf16 %v2072_v38, %v2070_v0 }
 0x28b   : > { %v2009_v4 = vmul.f32 0.2, %v3003_v33  ;;  %v3005_v41 = vadd.f32 %v1902_v39, %v3999_v6  ;;  %v1904_v50 = vpop.f32.mrb[67].mxu0 }
 0x28c   : > { %v2010_v42 = vmul.f32 0.2, %v3004_v34  ;;  %v3006_v2 = vadd.f32 %v1904_v50, %v4003_v12  ;;  %2360 = vmatprep.mubr.bf16.mxu1 %v2120_v18 }
 0x28d   : > { %v2011_v16 = vmul.f32 0.2, %v3005_v41  ;;  %2361 = vmatmul.mubr.bf16.gmra.mrb[124].mxu1 %v2119_v40  ;;  %v2073_v57 = vmax.f32 %v3003_v33, %v2009_v4 }
 0x28e   : > { %v2012_v45 = vmul.f32 0.2, %v3006_v2  ;;  %v2074_v29 = vmax.f32 %v3004_v34, %v2010_v42 }
 0x28f   : > { %v2075_v46 = vmax.f32 %v3005_v41, %v2011_v16 }
 0x290   : > { %v2076_v49 = vmax.f32 %v3006_v2, %v2012_v45  ;;  %v1908_v22 = vpop.f32.mrb[68].mxu0 }
 0x291   : > { %v3007_v53 = vadd.f32 %v1908_v22, %v3999_v6  ;;  %v1910_v24 = vpop.f32.mrb[69].mxu0  ;;  %v2121_v17 = vpack.c.bf16 %v2075_v46, %v2073_v57 }
 0x292   : > { %v3008_v55 = vadd.f32 %v1910_v24, %v4003_v12  ;;  %v1912_v56 = vpop.f32.mrb[70].mxu0  ;;  %v2122_v32 = vpack.c.bf16 %v2076_v49, %v2074_v29 }
 0x293   : > { %v2013_v59 = vmul.f32 0.2, %v3007_v53  ;;  %v3009_v8 = vadd.f32 %v1912_v56, %v3999_v6  ;;  %v1914_v60 = vpop.f32.mrb[71].mxu0 }
 0x294   : > { %v2014_v36 = vmul.f32 0.2, %v3008_v55  ;;  %v3010_v31 = vadd.f32 %v1914_v60, %v4003_v12  ;;  %2368 = vmatprep.mubr.bf16.mxu1 %v2122_v32 }
 0x295   : > { %v2015_v47 = vmul.f32 0.2, %v3009_v8  ;;  %2369 = vmatmul.mubr.bf16.gmra.mrb[128].mxu1 %v2121_v17  ;;  %v2077_v9 = vmax.f32 %v3007_v53, %v2013_v59 }
 0x296   : > { %v2016_v19 = vmul.f32 0.2, %v3010_v31  ;;  %v2078_v52 = vmax.f32 %v3008_v55, %v2014_v36 }
 0x297   : > { %v2079_v48 = vmax.f32 %v3009_v8, %v2015_v47 }
 0x298   : > { %v2080_v37 = vmax.f32 %v3010_v31, %v2016_v19  ;;  %v1918_v3 = vpop.f32.mrb[72].mxu0 }
 0x299   : > { %v3011_v35 = vadd.f32 %v1918_v3, %v3999_v6  ;;  %v1920_v58 = vpop.f32.mrb[73].mxu0  ;;  %v2123_v61 = vpack.c.bf16 %v2079_v48, %v2077_v9 }
 0x29a   : > { %v3012_v51 = vadd.f32 %v1920_v58, %v4003_v12  ;;  %v1922_v43 = vpop.f32.mrb[74].mxu0  ;;  %v2124_v63 = vpack.c.bf16 %v2080_v37, %v2078_v52 }
 0x29b   : > { %v2017_v44 = vmul.f32 0.2, %v3011_v35  ;;  %v3013_v1 = vadd.f32 %v1922_v43, %v3999_v6  ;;  %v1924_v5 = vpop.f32.mrb[75].mxu0 }
 0x29c   : > { %v2018_v7 = vmul.f32 0.2, %v3012_v51  ;;  %v3014_v11 = vadd.f32 %v1924_v5, %v4003_v12  ;;  %2376 = vmatprep.mubr.bf16.mxu1 %v2124_v63 }
 0x29d   : > { %v2019_v14 = vmul.f32 0.2, %v3013_v1  ;;  %2377 = vmatmul.mubr.bf16.gmra.mrb[132].mxu1 %v2123_v61  ;;  %v2081_v13 = vmax.f32 %v3011_v35, %v2017_v44 }
 0x29e   : > { %v2020_v30 = vmul.f32 0.2, %v3014_v11  ;;  %v2082_v23 = vmax.f32 %v3012_v51, %v2018_v7 }
 0x29f   : > { %v2083_v15 = vmax.f32 %v3013_v1, %v2019_v14 }
 0x2a0   : > { %v2084_v54 = vmax.f32 %v3014_v11, %v2020_v30  ;;  %v1928_v10 = vpop.f32.mrb[76].mxu0 }
 0x2a1   : > { %v3015_v21 = vadd.f32 %v1928_v10, %v3999_v6  ;;  %v1930_v20 = vpop.f32.mrb[77].mxu0  ;;  %v2125_v0 = vpack.c.bf16 %v2083_v15, %v2081_v13 }
 0x2a2   : > { %v3016_v38 = vadd.f32 %v1930_v20, %v4003_v12  ;;  %v1932_v25 = vpop.f32.mrb[78].mxu0  ;;  %v2126_v33 = vpack.c.bf16 %v2084_v54, %v2082_v23 }
 0x2a3   : > { %v2021_v62 = vmul.f32 0.2, %v3015_v21  ;;  %v3017_v40 = vadd.f32 %v1932_v25, %v3999_v6  ;;  %v1934_v34 = vpop.f32.mrb[79].mxu0 }
 0x2a4   : > { %v2022_v39 = vmul.f32 0.2, %v3016_v38  ;;  %v3018_v18 = vadd.f32 %v1934_v34, %v4003_v12  ;;  %2384 = vmatprep.mubr.bf16.mxu1 %v2126_v33 }
 0x2a5   : > { %v2023_v4 = vmul.f32 0.2, %v3017_v40  ;;  %2385 = vmatmul.mubr.bf16.gmra.mrb[136].mxu1 %v2125_v0  ;;  %v2085_v50 = vmax.f32 %v3015_v21, %v2021_v62 }
 0x2a6   : > { %v2024_v41 = vmul.f32 0.2, %v3018_v18  ;;  %v2086_v2 = vmax.f32 %v3016_v38, %v2022_v39 }
 0x2a7   : > { %v2087_v42 = vmax.f32 %v3017_v40, %v2023_v4 }
 0x2a8   : > { %v2088_v16 = vmax.f32 %v3018_v18, %v2024_v41  ;;  %v1938_v45 = vpop.f32.mrb[80].mxu0 }
 0x2a9   : > { %v3019_v57 = vadd.f32 %v1938_v45, %v3999_v6  ;;  %v1940_v46 = vpop.f32.mrb[81].mxu0  ;;  %v2127_v29 = vpack.c.bf16 %v2087_v42, %v2085_v50 }
 0x2aa   : > { %v3020_v49 = vadd.f32 %v1940_v46, %v4003_v12  ;;  %v1942_v22 = vpop.f32.mrb[82].mxu0  ;;  %v2128_v53 = vpack.c.bf16 %v2088_v16, %v2086_v2 }
 0x2ab   : > { %v2025_v24 = vmul.f32 0.2, %v3019_v57  ;;  %v3021_v17 = vadd.f32 %v1942_v22, %v3999_v6  ;;  %v1944_v55 = vpop.f32.mrb[83].mxu0 }
 0x2ac   : > { %v2026_v56 = vmul.f32 0.2, %v3020_v49  ;;  %v3022_v32 = vadd.f32 %v1944_v55, %v4003_v12  ;;  %2392 = vmatprep.mubr.bf16.mxu1 %v2128_v53 }
 0x2ad   : > { %v2027_v59 = vmul.f32 0.2, %v3021_v17  ;;  %2393 = vmatmul.mubr.bf16.gmra.mrb[140].mxu1 %v2127_v29  ;;  %v2089_v60 = vmax.f32 %v3019_v57, %v2025_v24 }
 0x2ae   : > { %v2028_v8 = vmul.f32 0.2, %v3022_v32  ;;  %v2090_v31 = vmax.f32 %v3020_v49, %v2026_v56 }
 0x2af   : > { %v2091_v36 = vmax.f32 %v3021_v17, %v2027_v59 }
 0x2b0   : > { %v2092_v47 = vmax.f32 %v3022_v32, %v2028_v8  ;;  %v1948_v19 = vpop.f32.mrb[84].mxu0 }
 0x2b1   : > { %v3023_v9 = vadd.f32 %v1948_v19, %v3999_v6  ;;  %v1950_v48 = vpop.f32.mrb[85].mxu0  ;;  %v2129_v52 = vpack.c.bf16 %v2091_v36, %v2089_v60 }
 0x2b2   : > { %v3024_v37 = vadd.f32 %v1950_v48, %v4003_v12  ;;  %v1952_v3 = vpop.f32.mrb[86].mxu0  ;;  %v2130_v35 = vpack.c.bf16 %v2092_v47, %v2090_v31 }
 0x2b3   : > { %v2029_v58 = vmul.f32 0.2, %v3023_v9  ;;  %v3025_v61 = vadd.f32 %v1952_v3, %v3999_v6  ;;  %v1954_v51 = vpop.f32.mrb[87].mxu0  ;;  %v4079_v3 = vld [vmem:[%s4155_s7] sm:$0x1] }
 0x2b4   : > { %v2030_v43 = vmul.f32 0.2, %v3024_v37  ;;  %v3026_v63 = vadd.f32 %v1954_v51, %v4003_v12  ;;  %2400 = vmatprep.mubr.bf16.mxu1 %v2130_v35 }
 0x2b5   : > { %v2031_v44 = vmul.f32 0.2, %v3025_v61  ;;  %2401 = vmatmul.mubr.bf16.gmra.mrb[144].mxu1 %v2129_v52  ;;  %v2093_v5 = vmax.f32 %v3023_v9, %v2029_v58 }
 0x2b6   : > { %v2032_v1 = vmul.f32 0.2, %v3026_v63  ;;  %v2094_v11 = vmax.f32 %v3024_v37, %v2030_v43 }
 0x2b7   : > { %v2095_v7 = vmax.f32 %v3025_v61, %v2031_v44 }
 0x2b8   : > { %v2096_v14 = vmax.f32 %v3026_v63, %v2032_v1  ;;  %v1958_v30 = vpop.f32.mrb[88].mxu0 }
 0x2b9   : > { %v3027_v13 = vadd.f32 %v1958_v30, %v3999_v6  ;;  %v1960_v15 = vpop.f32.mrb[89].mxu0  ;;  %v2131_v23 = vpack.c.bf16 %v2095_v7, %v2093_v5 }
 0x2ba   : > { %v3028_v54 = vadd.f32 %v1960_v15, %v4003_v12  ;;  %v1962_v10 = vpop.f32.mrb[90].mxu0  ;;  %v2132_v21 = vpack.c.bf16 %v2096_v14, %v2094_v11 }
 0x2bb   : > { %v2033_v20 = vmul.f32 0.2, %v3027_v13  ;;  %v3029_v0 = vadd.f32 %v1962_v10, %v3999_v6  ;;  %v1964_v38 = vpop.f32.mrb[91].mxu0 }
 0x2bc   : > { %v2034_v25 = vmul.f32 0.2, %v3028_v54  ;;  %v3030_v33 = vadd.f32 %v1964_v38, %v4003_v12  ;;  %2408 = vmatprep.mubr.bf16.mxu1 %v2132_v21 }
 0x2bd   : > { %v2035_v62 = vmul.f32 0.2, %v3029_v0  ;;  %2409 = vmatmul.mubr.bf16.gmra.mrb[148].mxu1 %v2131_v23  ;;  %v2097_v34 = vmax.f32 %v3027_v13, %v2033_v20  ;;  %v2498_v13 = vld [vmem:[#allocation2] sm:$0x1] }
 0x2be   : > { %v2036_v40 = vmul.f32 0.2, %v3030_v33  ;;  %v2098_v18 = vmax.f32 %v3028_v54, %v2034_v25  ;;  %2501 = vperm.xlu0 %3109, %v2498_v13  }
 0x2bf   : > { %v2099_v39 = vmax.f32 %v3029_v0, %v2035_v62 }
 0x2c0   : > { %v2100_v4 = vmax.f32 %v3030_v33, %v2036_v40  ;;  %v1968_v41 = vpop.f32.mrb[92].mxu0 }
 0x2c1   : > { %v3031_v50 = vadd.f32 %v1968_v41, %v3999_v6  ;;  %v1970_v42 = vpop.f32.mrb[93].mxu0  ;;  %v2133_v2 = vpack.c.bf16 %v2099_v39, %v2097_v34 }
 0x2c2   : > { %v3032_v16 = vadd.f32 %v1970_v42, %v4003_v12  ;;  %v1972_v45 = vpop.f32.mrb[94].mxu0  ;;  %v2134_v57 = vpack.c.bf16 %v2100_v4, %v2098_v18 }
 0x2c3   : > { %v2037_v46 = vmul.f32 0.2, %v3031_v50  ;;  %v3033_v29 = vadd.f32 %v1972_v45, %v3999_v6  ;;  %v1974_v49 = vpop.f32.mrb[95].mxu0  ;;  %v4072_v6 = vld [vmem:[%s4154_s6] ss:$0 sm:$0xff] }
 0x2c4   : > { %v2038_v22 = vmul.f32 0.2, %v3032_v16  ;;  %v3034_v53 = vadd.f32 %v1974_v49, %v4003_v12  ;;  %2416 = vmatprep.mubr.bf16.mxu1 %v2134_v57 }
 0x2c5   : > { %v2039_v24 = vmul.f32 0.2, %v3033_v29  ;;  %2417 = vmatmul.mubr.bf16.gmra.mrb[152].mxu1 %v2133_v2  ;;  %v2101_v55 = vmax.f32 %v3031_v50, %v2037_v46 }
 0x2c6   : > { %v2040_v17 = vmul.f32 0.2, %v3034_v53  ;;  %v2102_v32 = vmax.f32 %v3032_v16, %v2038_v22 }
 0x2c7   : > { %v2103_v56 = vmax.f32 %v3033_v29, %v2039_v24 }
 0x2c8   : > { %v2104_v59 = vmax.f32 %v3034_v53, %v2040_v17 }
 0x2c9   : > { %v2135_v8 = vpack.c.bf16 %v2103_v56, %v2101_v55 }
 0x2ca   : > { %v2136_v60 = vpack.c.bf16 %v2104_v59, %v2102_v32 }
 0x2cc   : > { %2424 = vmatprep.mubr.bf16.mxu1 %v2136_v60 }
 0x2cd   : > { %2425 = vmatmul.mubr.bf16.gmra.mrb[156].mxu1 %v2135_v8 }
 0x2ce   : > { %2935 = vmatprep.mubr.f32.mxu1 %v4079_v3 }
 0x328   : > { %v2807_v36 = vpop.f32.mrb[96].mxu1 }
 0x329   : > { %v2808_v31 = vpop.f32.mrb[97].mxu1 }
 0x32a   : > { %v2809_v12 = vadd.f32 %v2808_v31, %v2807_v36  ;;  %v2810_v47 = vpop.f32.mrb[98].mxu1 }
 0x32b   : > { %v2811_v19 = vpop.f32.mrb[99].mxu1 }
 0x32c   : > { %v2307_v9 = vadd.f32 %v2809_v12, %v4072_v6  ;;  %v2812_v48 = vadd.f32 %v2811_v19, %v2810_v47 }
 0x32e   : > { %v2433_v52 = vmul.f32 0.2, %v2307_v9  ;;  %v2310_v37 = vadd.f32 %v2812_v48, %v4072_v6 }
 0x330   : > { %v2434_v35 = vmul.f32 0.2, %v2310_v37  ;;  %v2813_v58 = vpop.f32.mrb[100].mxu1  ;;  %v2465_v51 = vmax.f32 %v2307_v9, %v2433_v52 }
 0x331   : > { %v2814_v61 = vpop.f32.mrb[101].mxu1 }
 0x332   : > { %v2466_v43 = vmax.f32 %v2310_v37, %v2434_v35  ;;  %v2815_v63 = vadd.f32 %v2814_v61, %v2813_v58  ;;  %v2816_v44 = vpop.f32.mrb[102].mxu1 }
 0x333   : > { %v2817_v1 = vpop.f32.mrb[103].mxu1 }
 0x334   : > { %v4082_v5 = vpack.c.bf16 %v2466_v43, %v2465_v51  ;;  %v2315_v7 = vadd.f32 %v2815_v63, %v4072_v6  ;;  %v2818_v11 = vadd.f32 %v2817_v1, %v2816_v44 }
 0x336   : > { %v2435_v14 = vmul.f32 0.2, %v2315_v7  ;;  %v2318_v30 = vadd.f32 %v2818_v11, %v4072_v6 }
 0x338   : > { %v2436_v15 = vmul.f32 0.2, %v2318_v30  ;;  %v2819_v23 = vpop.f32.mrb[104].mxu1  ;;  %v2467_v10 = vmax.f32 %v2315_v7, %v2435_v14 }
 0x339   : > { %v2820_v54 = vpop.f32.mrb[105].mxu1 }
 0x33a   : > { %v2468_v21 = vmax.f32 %v2318_v30, %v2436_v15  ;;  %v2821_v20 = vadd.f32 %v2820_v54, %v2819_v23  ;;  %v2822_v0 = vpop.f32.mrb[106].mxu1 }
 0x33b   : > { %v2823_v38 = vpop.f32.mrb[107].mxu1 }
 0x33c   : > { %v4086_v25 = vpack.c.bf16 %v2468_v21, %v2467_v10  ;;  %v2323_v33 = vadd.f32 %v2821_v20, %v4072_v6  ;;  %v2824_v62 = vadd.f32 %v2823_v38, %v2822_v0 }
 0x33e   : > { %v2437_v40 = vmul.f32 0.2, %v2323_v33  ;;  %v2326_v34 = vadd.f32 %v2824_v62, %v4072_v6 }
 0x340   : > { %v2438_v39 = vmul.f32 0.2, %v2326_v34  ;;  %v2825_v18 = vpop.f32.mrb[108].mxu1  ;;  %v2469_v41 = vmax.f32 %v2323_v33, %v2437_v40 }
 0x341   : > { %v2826_v4 = vpop.f32.mrb[109].mxu1 }
 0x342   : > { %v2470_v50 = vmax.f32 %v2326_v34, %v2438_v39  ;;  %v2827_v42 = vadd.f32 %v2826_v4, %v2825_v18  ;;  %v2828_v2 = vpop.f32.mrb[110].mxu1 }
 0x343   : > { %v2829_v16 = vpop.f32.mrb[111].mxu1 }
 0x344   : > { %v4090_v45 = vpack.c.bf16 %v2470_v50, %v2469_v41  ;;  %v2331_v57 = vadd.f32 %v2827_v42, %v4072_v6  ;;  %v2830_v46 = vadd.f32 %v2829_v16, %v2828_v2 }
 0x346   : > { %v2439_v29 = vmul.f32 0.2, %v2331_v57  ;;  %v2334_v49 = vadd.f32 %v2830_v46, %v4072_v6 }
 0x348   : > { %v2440_v22 = vmul.f32 0.2, %v2334_v49  ;;  %v2831_v53 = vpop.f32.mrb[112].mxu1  ;;  %v2471_v17 = vmax.f32 %v2331_v57, %v2439_v29 }
 0x349   : > { %v2832_v24 = vpop.f32.mrb[113].mxu1 }
 0x34a   : > { %v2472_v55 = vmax.f32 %v2334_v49, %v2440_v22  ;;  %v2833_v56 = vadd.f32 %v2832_v24, %v2831_v53  ;;  %v2834_v32 = vpop.f32.mrb[114].mxu1 }
 0x34b   : > { %v2835_v59 = vpop.f32.mrb[115].mxu1 }
 0x34c   : > { %v4094_v8 = vpack.c.bf16 %v2472_v55, %v2471_v17  ;;  %v2339_v60 = vadd.f32 %v2833_v56, %v4072_v6  ;;  %v2836_v36 = vadd.f32 %v2835_v59, %v2834_v32 }
 0x34e   : > { %v2441_v31 = vmul.f32 0.2, %v2339_v60  ;;  %v2342_v12 = vadd.f32 %v2836_v36, %v4072_v6 }
 0x350   : > { %v2442_v47 = vmul.f32 0.2, %v2342_v12  ;;  %v2837_v19 = vpop.f32.mrb[116].mxu1  ;;  %v2473_v48 = vmax.f32 %v2339_v60, %v2441_v31 }
 0x351   : > { %v2838_v9 = vpop.f32.mrb[117].mxu1 }
 0x352   : > { %v2474_v52 = vmax.f32 %v2342_v12, %v2442_v47  ;;  %v2839_v37 = vadd.f32 %v2838_v9, %v2837_v19  ;;  %v2840_v35 = vpop.f32.mrb[118].mxu1 }
 0x353   : > { %v2841_v58 = vpop.f32.mrb[119].mxu1 }
 0x354   : > { %v4098_v61 = vpack.c.bf16 %v2474_v52, %v2473_v48  ;;  %v2347_v51 = vadd.f32 %v2839_v37, %v4072_v6  ;;  %v2842_v43 = vadd.f32 %v2841_v58, %v2840_v35 }
 0x356   : > { %v2443_v63 = vmul.f32 0.2, %v2347_v51  ;;  %v2350_v44 = vadd.f32 %v2842_v43, %v4072_v6 }
 0x358   : > { %v2444_v1 = vmul.f32 0.2, %v2350_v44  ;;  %v2843_v7 = vpop.f32.mrb[120].mxu1  ;;  %v2475_v14 = vmax.f32 %v2347_v51, %v2443_v63 }
 0x359   : > { %v2844_v11 = vpop.f32.mrb[121].mxu1 }
 0x35a   : > { %v2476_v30 = vmax.f32 %v2350_v44, %v2444_v1  ;;  %v2845_v13 = vadd.f32 %v2844_v11, %v2843_v7  ;;  %v2846_v15 = vpop.f32.mrb[122].mxu1 }
 0x35b   : > { %v2847_v23 = vpop.f32.mrb[123].mxu1 }
 0x35c   : > { %v4102_v54 = vpack.c.bf16 %v2476_v30, %v2475_v14  ;;  %v2355_v10 = vadd.f32 %v2845_v13, %v4072_v6  ;;  %v2848_v21 = vadd.f32 %v2847_v23, %v2846_v15 }
 0x35e   : > { %v2445_v20 = vmul.f32 0.2, %v2355_v10  ;;  %v2358_v0 = vadd.f32 %v2848_v21, %v4072_v6 }
 0x360   : > { %v2446_v38 = vmul.f32 0.2, %v2358_v0  ;;  %v2849_v33 = vpop.f32.mrb[124].mxu1  ;;  %v2477_v40 = vmax.f32 %v2355_v10, %v2445_v20 }
 0x361   : > { %v2850_v62 = vpop.f32.mrb[125].mxu1 }
 0x362   : > { %v2478_v34 = vmax.f32 %v2358_v0, %v2446_v38  ;;  %v2851_v39 = vadd.f32 %v2850_v62, %v2849_v33  ;;  %v2852_v18 = vpop.f32.mrb[126].mxu1 }
 0x363   : > { %v2853_v4 = vpop.f32.mrb[127].mxu1 }
 0x364   : > { %v4106_v41 = vpack.c.bf16 %v2478_v34, %v2477_v40  ;;  %v2363_v50 = vadd.f32 %v2851_v39, %v4072_v6  ;;  %v2854_v42 = vadd.f32 %v2853_v4, %v2852_v18 }
 0x366   : > { %v2447_v2 = vmul.f32 0.2, %v2363_v50  ;;  %v2366_v16 = vadd.f32 %v2854_v42, %v4072_v6 }
 0x368   : > { %v2448_v57 = vmul.f32 0.2, %v2366_v16  ;;  %v2855_v46 = vpop.f32.mrb[128].mxu1  ;;  %v2479_v49 = vmax.f32 %v2363_v50, %v2447_v2 }
 0x369   : > { %v2856_v29 = vpop.f32.mrb[129].mxu1 }
 0x36a   : > { %v2480_v22 = vmax.f32 %v2366_v16, %v2448_v57  ;;  %v2857_v53 = vadd.f32 %v2856_v29, %v2855_v46  ;;  %v2858_v24 = vpop.f32.mrb[130].mxu1 }
 0x36b   : > { %v2859_v17 = vpop.f32.mrb[131].mxu1 }
 0x36c   : > { %v4110_v55 = vpack.c.bf16 %v2480_v22, %v2479_v49  ;;  %v2371_v56 = vadd.f32 %v2857_v53, %v4072_v6  ;;  %v2860_v32 = vadd.f32 %v2859_v17, %v2858_v24 }
 0x36e   : > { %v2449_v59 = vmul.f32 0.2, %v2371_v56  ;;  %v2374_v60 = vadd.f32 %v2860_v32, %v4072_v6 }
 0x370   : > { %v2450_v36 = vmul.f32 0.2, %v2374_v60  ;;  %v2861_v31 = vpop.f32.mrb[132].mxu1  ;;  %v2481_v47 = vmax.f32 %v2371_v56, %v2449_v59 }
 0x371   : > { %v2862_v12 = vpop.f32.mrb[133].mxu1 }
 0x372   : > { %v2482_v19 = vmax.f32 %v2374_v60, %v2450_v36  ;;  %v2863_v9 = vadd.f32 %v2862_v12, %v2861_v31  ;;  %v2864_v48 = vpop.f32.mrb[134].mxu1 }
 0x373   : > { %v2865_v52 = vpop.f32.mrb[135].mxu1 }
 0x374   : > { %v2379_v37 = vadd.f32 %v2863_v9, %v4072_v6  ;;  %v2866_v35 = vadd.f32 %v2865_v52, %v2864_v48  ;;  %v2937_v58 = vpack.c.bf16 %v2482_v19, %v2481_v47 }
 0x376   : > { %v2451_v51 = vmul.f32 0.2, %v2379_v37  ;;  %v2382_v43 = vadd.f32 %v2866_v35, %v4072_v6  ;;  %2938 = vmatprep.subr.bf16.mxu1 %v2937_v58 }
 0x377   : > { %2940 = vmatpush3.bf16.xpose.msra.mxu1 %v4082_v5 }
 0x378   : > { %v2452_v63 = vmul.f32 0.2, %v2382_v43  ;;  %v2867_v44 = vpop.f32.mrb[136].mxu1  ;;  %v2483_v7 = vmax.f32 %v2379_v37, %v2451_v51 }
 0x379   : > { %v2868_v1 = vpop.f32.mrb[137].mxu1 }
 0x37a   : > { %v2484_v11 = vmax.f32 %v2382_v43, %v2452_v63  ;;  %v2869_v14 = vadd.f32 %v2868_v1, %v2867_v44  ;;  %v2870_v30 = vpop.f32.mrb[138].mxu1 }
 0x37b   : > { %v2871_v13 = vpop.f32.mrb[139].mxu1 }
 0x37c   : > { %v2387_v15 = vadd.f32 %v2869_v14, %v4072_v6  ;;  %v2872_v23 = vadd.f32 %v2871_v13, %v2870_v30  ;;  %v2941_v10 = vpack.c.bf16 %v2484_v11, %v2483_v7 }
 0x37e   : > { %v2453_v21 = vmul.f32 0.2, %v2387_v15  ;;  %v2390_v20 = vadd.f32 %v2872_v23, %v4072_v6  ;;  %2942 = vmatprep.subr.bf16.mxu1 %v2941_v10 }
 0x37f   : > { %2944 = vmatpush3.bf16.xpose.msra.mxu1 %v4086_v25 }
 0x380   : > { %v2454_v0 = vmul.f32 0.2, %v2390_v20  ;;  %v2873_v5 = vpop.f32.mrb[140].mxu1  ;;  %v2485_v33 = vmax.f32 %v2387_v15, %v2453_v21 }
 0x381   : > { %v2874_v38 = vpop.f32.mrb[141].mxu1 }
 0x382   : > { %v2486_v62 = vmax.f32 %v2390_v20, %v2454_v0  ;;  %v2875_v40 = vadd.f32 %v2874_v38, %v2873_v5  ;;  %v2876_v34 = vpop.f32.mrb[142].mxu1 }
 0x383   : > { %v2877_v39 = vpop.f32.mrb[143].mxu1 }
 0x384   : > { %v2395_v18 = vadd.f32 %v2875_v40, %v4072_v6  ;;  %v2878_v4 = vadd.f32 %v2877_v39, %v2876_v34  ;;  %v2945_v50 = vpack.c.bf16 %v2486_v62, %v2485_v33 }
 0x386   : > { %v2455_v42 = vmul.f32 0.2, %v2395_v18  ;;  %v2398_v2 = vadd.f32 %v2878_v4, %v4072_v6  ;;  %2946 = vmatprep.subr.bf16.mxu1 %v2945_v50 }
 0x387   : > { %2948 = vmatpush3.bf16.xpose.msra.mxu1 %v4090_v45 }
 0x388   : > { %v2456_v16 = vmul.f32 0.2, %v2398_v2  ;;  %v2879_v25 = vpop.f32.mrb[144].mxu1  ;;  %v2487_v46 = vmax.f32 %v2395_v18, %v2455_v42 }
 0x389   : > { %v2880_v57 = vpop.f32.mrb[145].mxu1 }
 0x38a   : > { %v2488_v29 = vmax.f32 %v2398_v2, %v2456_v16  ;;  %v2881_v49 = vadd.f32 %v2880_v57, %v2879_v25  ;;  %v2882_v22 = vpop.f32.mrb[146].mxu1  ;;  %v2502_v2 = vpop.permute.xlu0 %2501 }
 0x38b   : > { %v2883_v53 = vpop.f32.mrb[147].mxu1  ;;  %v2507_v16 = vrot.slane %v2502_v2, %v3575_v28 }
 0x38c   : > { %v2403_v24 = vadd.f32 %v2881_v49, %v4072_v6  ;;  %v2884_v17 = vadd.f32 %v2883_v53, %v2882_v22  ;;  %v2949_v56 = vpack.c.bf16 %v2488_v29, %v2487_v46 }
 0x38e   : > { %v2457_v32 = vmul.f32 0.2, %v2403_v24  ;;  %v2406_v59 = vadd.f32 %v2884_v17, %v4072_v6  ;;  %2950 = vmatprep.subr.bf16.mxu1 %v2949_v56 }
 0x38f   : > { %2952 = vmatpush3.bf16.xpose.msra.mxu1 %v4094_v8 }
 0x390   : > { %v2458_v60 = vmul.f32 0.2, %v2406_v59  ;;  %v2885_v45 = vpop.f32.mrb[148].mxu1  ;;  %v2489_v31 = vmax.f32 %v2403_v24, %v2457_v32 }
 0x391   : > { %v2886_v36 = vpop.f32.mrb[149].mxu1 }
 0x392   : > { %v2490_v12 = vmax.f32 %v2406_v59, %v2458_v60  ;;  %v2887_v47 = vadd.f32 %v2886_v36, %v2885_v45  ;;  %v2888_v19 = vpop.f32.mrb[150].mxu1 }
 0x393   : > { %v2889_v9 = vpop.f32.mrb[151].mxu1 }
 0x394   : > { %v2411_v48 = vadd.f32 %v2887_v47, %v4072_v6  ;;  %v2890_v52 = vadd.f32 %v2889_v9, %v2888_v19  ;;  %v2953_v37 = vpack.c.bf16 %v2490_v12, %v2489_v31 }
 0x396   : > { %v2459_v35 = vmul.f32 0.2, %v2411_v48  ;;  %v2414_v58 = vadd.f32 %v2890_v52, %v4072_v6  ;;  %2954 = vmatprep.subr.bf16.mxu1 %v2953_v37 }
 0x397   : > { %2956 = vmatpush3.bf16.xpose.msra.mxu1 %v4098_v61 }
 0x398   : > { %v2460_v51 = vmul.f32 0.2, %v2414_v58  ;;  %v2891_v8 = vpop.f32.mrb[152].mxu1  ;;  %v2491_v63 = vmax.f32 %v2411_v48, %v2459_v35 }
 0x399   : > { %v2892_v43 = vpop.f32.mrb[153].mxu1 }
 0x39a   : > { %v2492_v44 = vmax.f32 %v2414_v58, %v2460_v51  ;;  %v2893_v1 = vadd.f32 %v2892_v43, %v2891_v8  ;;  %v2894_v7 = vpop.f32.mrb[154].mxu1 }
 0x39b   : > { %v2895_v11 = vpop.f32.mrb[155].mxu1 }
 0x39c   : > { %v2419_v14 = vadd.f32 %v2893_v1, %v4072_v6  ;;  %v2896_v30 = vadd.f32 %v2895_v11, %v2894_v7  ;;  %v2957_v13 = vpack.c.bf16 %v2492_v44, %v2491_v63 }
 0x39e   : > { %v2461_v15 = vmul.f32 0.2, %v2419_v14  ;;  %v2422_v23 = vadd.f32 %v2896_v30, %v4072_v6  ;;  %2958 = vmatprep.subr.bf16.mxu1 %v2957_v13 }
 0x39f   : > { %2960 = vmatpush3.bf16.xpose.msra.mxu1 %v4102_v54 }
 0x3a0   : > { %v2462_v10 = vmul.f32 0.2, %v2422_v23  ;;  %v2897_v61 = vpop.f32.mrb[156].mxu1  ;;  %v2493_v20 = vmax.f32 %v2419_v14, %v2461_v15 }
 0x3a1   : > { %v2898_v21 = vpop.f32.mrb[157].mxu1 }
 0x3a2   : > { %v2494_v0 = vmax.f32 %v2422_v23, %v2462_v10  ;;  %v2899_v5 = vadd.f32 %v2898_v21, %v2897_v61  ;;  %v2900_v38 = vpop.f32.mrb[158].mxu1 }
 0x3a3   : > { %v2901_v33 = vpop.f32.mrb[159].mxu1 }
 0x3a4   : > { %v2427_v62 = vadd.f32 %v2899_v5, %v4072_v6  ;;  %v2902_v40 = vadd.f32 %v2901_v33, %v2900_v38  ;;  %v2961_v34 = vpack.c.bf16 %v2494_v0, %v2493_v20 }
 0x3a6   : > { %v2463_v39 = vmul.f32 0.2, %v2427_v62  ;;  %v2430_v18 = vadd.f32 %v2902_v40, %v4072_v6  ;;  %2962 = vmatprep.subr.bf16.mxu1 %v2961_v34 }
 0x3a7   : > { %2964 = vmatpush3.bf16.xpose.msra.mxu1 %v4106_v41 }
 0x3a8   : > { %v2464_v4 = vmul.f32 0.2, %v2430_v18  ;;  %v2495_v54 = vmax.f32 %v2427_v62, %v2463_v39 }
 0x3aa   : > { %v2496_v50 = vmax.f32 %v2430_v18, %v2464_v4 }
 0x3ac   : > { %v2965_v42 = vpack.c.bf16 %v2496_v50, %v2495_v54 }
 0x3ae   : > { %2966 = vmatprep.subr.bf16.mxu1 %v2965_v42 }
 0x3af   : > { %2968 = vmatpush3.bf16.xpose.msra.mxu1 %v4110_v55 }
 0x3b6   : > { %2936 = vmatmul.mubr.f32.vlgmr.msra.gmra.mrb[160].mxu1 %v4079_v3  ;;  %v3245_v3 = vmov 1966171168  }
 0x3b7   : > { %v2593_v56 = vunpack.c.l.s4 %v3245_v3 }
 0x3b9   : > { %v2594_v28 = vunpack.c.0.s8 %v2593_v56 }
 0x3bb   : > { %v2597_v59 = vsub.s32 %v2594_v28, %v3572_v27 }
 0x489   : > { %v2574_v25 = vpop.f32.mrb[160].mxu1 }
 0x48a   : > { %v2575_v57 = vadd.f32 %v2574_v25, %v2507_v16  ;;  %v2576_v46 = vpop.f32.mrb[161].mxu1 }
 0x48b   : > { %v2577_v6 = vadd.f32 %v2576_v46, %v2507_v16 }
 0x48c   : > { %v2579_v29 = vsub.f32 0.0, %v2575_v57 }
 0x48d   : > { %v2580_v49 = vsub.f32 0.0, %v2577_v6 }
 0x48e   : > { %v2581_v41 = vmul.f32 1.442695, %v2579_v29 }
 0x48f   : > { %v2583_v22 = vmul.f32 1.442695, %v2580_v49 }
 0x490   : > { %3228 = vpow2.f32 %v2581_v41 }
 0x491   : > { %3230 = vpow2.f32 %v2583_v22 }
 0x49a   : > { %v3229_v53 = vpop.eup %3228 }
 0x49b   : > { %v3231_v24 = vpop.eup %3230  ;;  %v2585_v17 = vadd.f32 1.0, %v3229_v53 }
 0x49c   : > { %v2586_v55 = vadd.f32 1.0, %v3231_v24 }
 0x49d   : > { %3232 = vrcp.f32 %v2585_v17 }
 0x49e   : > { %3234 = vrcp.f32 %v2586_v55 }
 0x4a7   : > { %v3233_v32 = vpop.eup %3232 }
 0x4a8   : > { %v3235_v60 = vpop.eup %3234 }
 0x4a9   : > { %v2591_v45 = vcombine.low %v3233_v32, %v3235_v60 }
 0x4ab   : > { %v2598_v36 = vrot.slane %v2591_v45, %v2597_v59 }
 0x4ad   : > { %v2605_v31 = vrot.slane %v2598_v36, %v2597_v59 }
 0x4af   : > { %2611 = vst.msk [vmem:[%s334_s18] sm:$0x3] %vm2609_vm2, %v2605_v31 }
 0x4b0 PF: > { %s21_s11 = sadd.s32 1, %s3242_s11  }
 0x4b1   : > { %p18_p5 = scmp.ge.s32.totalorder %s21_s11, 4  }
 0x4b3   :  { %20 = sbr.rel (!%p18_p5) target bundleno = 3 (0x3), region = 86 }

</bundles_post_ra>
